<compile_context>
chip_gen: v5e
topology: v5e:2x2
jax: 0.10.0
libtpu: 0.0.40
codegen_flags: <defaults>
</compile_context>

<pallas_src>
import functools

import jax
import jax.numpy as jnp
import numpy as np
from jax.experimental import pallas as pl
from jax.experimental.pallas import tpu as pltpu

LANE = 128
SUB = 8


def _round_up(v, m):
    return -(-v // m) * m


def _cnn_bypass_kernel(
    lens_ref,     # (BT, 1)        int32 valid lengths (prefix mask)
    x_ref,        # (BT, Tp, D)    bf16 input embeddings
    w_in_ref,     # (D, Hp)        bf16
    b_in_ref,     # (1, Hp)        f32
    w_conv_ref,   # (K, Hp, Hp)    bf16, tap-major conv weights
    b_conv_ref,   # (1, Hp)        f32
    w_fc_ref,     # (Hp, Hp)       bf16
    b_fc_ref,     # (1, Hp)        f32
    w_head_ref,   # (Hp, 2*Hp)     bf16, [hidden2mean | hidden2logv]
    b_head_ref,   # (1, 2*Hp)      f32
    out_ref,      # (BT, 2*Hp)     f32 output: [mu | log_sigma]
    *maybe_scratch,               # (BT, Tp+2*pad, Hp) f32 iff conv_mode=="scratch"
    conv_mode,
):
    BT, Tp, D = x_ref.shape
    Hp = w_in_ref.shape[1]
    K = w_conv_ref.shape[0]
    pad = (K - 1) // 2
    R = BT * Tp
    bf16 = jnp.bfloat16

    # Prefix time mask rebuilt in-kernel from lengths (no (B,T,1) mask DMA).
    lens = lens_ref[...].reshape(BT, 1, 1)                         # int32
    t_iota = jax.lax.broadcasted_iota(jnp.int32, (BT, Tp, 1), 1)
    fmask = (t_iota < lens).astype(jnp.float32)                    # (BT, Tp, 1)

    # word-vec layer: linear_input + ReLU, then mask (elementwise in f32).
    h = jnp.dot(x_ref[...].reshape(R, D), w_in_ref[...],
                preferred_element_type=jnp.float32) + b_in_ref[...]
    z = jnp.maximum(h, 0.0).reshape(BT, Tp, Hp) * fmask            # f32

    # Conv1d(Hp, Hp, K, padding=pad): K MXU matmuls over the taps.
    if conv_mode == "roll":
        # Scratch-free: per-tap time shift applied to the tap *output* with an
        # XLU roll over the flattened (BT*Tp) row axis.  Tp >= T+pad makes the
        # rows a positive-shift roll wraps in zero (masked tail) rows; rows a
        # negative-shift roll corrupts are tail rows zeroed by fmask below.
        z_bf = z.reshape(R, Hp).astype(bf16)          # single cast for the MXU
        acc = None
        for j in range(K):                            # K is a small static const
            y = jnp.dot(z_bf, w_conv_ref[j], preferred_element_type=jnp.float32)
            shift = (pad - j) % R
            if shift:
                y = pltpu.roll(y, shift=shift, axis=0)
            acc = y if acc is None else acc + y
    else:
        # Fallback (previously validated): zero-padded f32 VMEM scratch +
        # K shifted reads.  Only the two pad slabs are zeroed (every grid
        # step, so megacore grid splitting stays correct).
        zp_ref, = maybe_scratch
        if pad > 0:
            zp_ref[:, :pad, :] = jnp.zeros((BT, pad, Hp), zp_ref.dtype)
            zp_ref[:, pad + Tp:, :] = jnp.zeros((BT, pad, Hp), zp_ref.dtype)
        zp_ref[:, pad:pad + Tp, :] = z
        acc = None
        for j in range(K):
            zj = zp_ref[:, j:j + Tp, :].reshape(R, Hp).astype(bf16)
            y = jnp.dot(zj, w_conv_ref[j], preferred_element_type=jnp.float32)
            acc = y if acc is None else acc + y

    c1 = jnp.maximum(acc + b_conv_ref[...], 0.0).reshape(BT, Tp, Hp) * fmask

    # pool == 'max' over the time axis.
    fc_in = jnp.max(c1, axis=1)                                    # (BT, Hp)

    # fc_hidden + ReLU (dropout = identity in eval mode).
    fch = jnp.maximum(
        jnp.dot(fc_in.astype(bf16), w_fc_ref[...],
                preferred_element_type=jnp.float32) + b_fc_ref[...], 0.0)

    # fused hidden2mean | hidden2logv head -> single lane-dense store.
    out_ref[...] = (jnp.dot(fch.astype(bf16), w_head_ref[...],
                            preferred_element_type=jnp.float32)
                    + b_head_ref[...])


def cnn_model_bypass_forward(x, mask, params, *, rows_per_tile=2048):
    """x: (B, T, D) float, mask: (B, T) 0/1 prefix mask. Returns (mu, log_sigma, None)."""
    B, T, D = x.shape
    H = params["w_in"].shape[1]
    K = params["w_conv"].shape[0]
    pad = (K - 1) // 2
    f32, bf16 = jnp.float32, jnp.bfloat16

    Hp = _round_up(H, LANE)              # lane-align hidden dim
    Tp = _round_up(T + pad, SUB)         # >= T+pad (scratch-free conv) & sublane aligned

    # ---- weights: pad to the lane-aligned hidden dim, bf16 for the MXU ----
    def pad2(w, r, c):
        return jnp.pad(w, ((0, r - w.shape[0]), (0, c - w.shape[1])))

    w_in = pad2(params["w_in"], D, Hp).astype(bf16)
    b_in = pad2(params["b_in"], 1, Hp).astype(f32)
    w_conv = jnp.pad(params["w_conv"],
                     ((0, 0), (0, Hp - H), (0, Hp - H))).astype(bf16)
    b_conv = pad2(params["b_conv"], 1, Hp).astype(f32)
    w_fc = pad2(params["w_fc"], Hp, Hp).astype(bf16)
    b_fc = pad2(params["b_fc"], 1, Hp).astype(f32)
    # Fused mean/logv head -> one (Hp, 2*Hp) matmul, lane-dense output slab.
    w_head = jnp.concatenate([pad2(params["w_mu"], Hp, Hp),
                              pad2(params["w_lv"], Hp, Hp)], axis=1).astype(bf16)
    b_head = jnp.concatenate([pad2(params["b_mu"], 1, Hp),
                              pad2(params["b_lv"], 1, Hp)], axis=1).astype(f32)

    # ---- per-generation VMEM budget & batch-tile selection ----
    try:
        vmem_cap = int(getattr(pltpu.get_tpu_info(), "vmem_capacity_bytes",
                               64 * 1024 * 1024))
    except Exception:
        vmem_cap = 64 * 1024 * 1024
    vmem_budget = max(32 * 1024 * 1024, min(vmem_cap // 2, 64 * 1024 * 1024))

    w_bytes = 2 * ((w_in.size + w_conv.size + w_fc.size + w_head.size) * 2
                   + (b_in.size + b_conv.size + b_fc.size + b_head.size) * 4)

    def est_vmem(bt):
        rows = bt * Tp
        x_blk = 2 * bt * Tp * D * 2          # bf16, double-buffered
        out_blk = 2 * bt * 2 * Hp * 4
        lens_blk = 2 * SUB * LANE * 4
        live = 24 * rows * Hp                # z / per-tap y / acc / c1 copies (+fallback scratch)
        return x_blk + out_blk + lens_blk + w_bytes + live

    BT = max(1, min(B, rows_per_tile // Tp))
    if BT >= B and B >= 2 * SUB:
        BT = -(-B // 2)                      # v7x megacore: prefer >= 2 grid steps
    while BT > SUB and est_vmem(BT) > vmem_budget:
        BT //= 2
    if BT < B:                               # multi-tile -> sublane-friendly tile
        BT = _round_up(BT, SUB)
        if BT >= B:
            BT = B
    Bp = _round_up(B, BT)
    nB = Bp // BT

    # Zero-padding batch/time is transparent: padded rows carry length 0.
    x_p = jnp.pad(x.astype(bf16), ((0, Bp - B), (0, Tp - T), (0, 0)))
    lengths = jnp.sum(mask.astype(jnp.int32), axis=1)         # prefix-mask lengths
    lens_p = jnp.pad(lengths, (0, Bp - B)).reshape(Bp, 1).astype(jnp.int32)

    flops = 2 * Bp * Tp * (D * Hp + K * Hp * Hp) + 2 * Bp * (Hp * Hp + 2 * Hp * Hp)
    bytes_accessed = (x_p.size * 2 + lens_p.size * 4 + Bp * 2 * Hp * 4
                      + (w_in.size + w_conv.size + w_fc.size + w_head.size) * 2
                      + (b_in.size + b_conv.size + b_fc.size + b_head.size) * 4)

    def _invoke(weight_mode, conv_mode):
        wkw = {} if weight_mode is None else {"pipeline_mode": weight_mode}
        scratch = ([] if conv_mode == "roll"
                   else [pltpu.VMEM((BT, Tp + 2 * pad, Hp), jnp.float32)])
        grid_spec = pltpu.PrefetchScalarGridSpec(
            num_scalar_prefetch=0,
            grid=(nB,),
            in_specs=[
                pl.BlockSpec((BT, 1), lambda b: (b, 0)),
                pl.BlockSpec((BT, Tp, D), lambda b: (b, 0, 0)),
                pl.BlockSpec((D, Hp), lambda b: (0, 0), **wkw),
                pl.BlockSpec((1, Hp), lambda b: (0, 0), **wkw),
                pl.BlockSpec((K, Hp, Hp), lambda b: (0, 0, 0), **wkw),
                pl.BlockSpec((1, Hp), lambda b: (0, 0), **wkw),
                pl.BlockSpec((Hp, Hp), lambda b: (0, 0), **wkw),
                pl.BlockSpec((1, Hp), lambda b: (0, 0), **wkw),
                pl.BlockSpec((Hp, 2 * Hp), lambda b: (0, 0), **wkw),
                pl.BlockSpec((1, 2 * Hp), lambda b: (0, 0), **wkw),
            ],
            out_specs=pl.BlockSpec((BT, 2 * Hp), lambda b: (b, 0)),
            scratch_shapes=scratch,
        )
        return pl.pallas_call(
            functools.partial(_cnn_bypass_kernel, conv_mode=conv_mode),
            out_shape=jax.ShapeDtypeStruct((Bp, 2 * Hp), jnp.float32),
            grid_spec=grid_spec,
            compiler_params=pltpu.CompilerParams(
                dimension_semantics=("parallel",),       # v7x: 2 TCs split batch tiles
                vmem_limit_bytes=int(vmem_budget)),
            cost_estimate=pl.CostEstimate(
                flops=int(flops), transcendentals=0,
                bytes_accessed=int(bytes_accessed)),
        )(lens_p, x_p, w_in, b_in, w_conv, b_conv, w_fc, b_fc, w_head, b_head)

    # Feature-detect across jax/Mosaic versions: (a) single-buffered
    # grid-invariant weight blocks (pl.Buffered(1)), (b) sublane pltpu.roll.
    # Falls back to the previously-validated scratch-based conv if needed.
    attempts = []
    if hasattr(pl, "Buffered"):
        attempts.append((pl.Buffered(1), "roll"))
    attempts += [(None, "roll"), (None, "scratch")]

    out, last_err = None, None
    for weight_mode, conv_mode in attempts:
        try:
            out = _invoke(weight_mode, conv_mode)
            jax.block_until_ready(out)
            break
        except Exception as e:                 # version-portability fallback
            out, last_err = None, e
    if out is None:
        raise last_err

    mu = out[:B, :H]
    log_sigma = out[:B, Hp:Hp + H]
    return mu, log_sigma, None


def reference_forward(x, mask, params):
    """Plain-JAX f32 reference (independent code path) for validation."""
    hp = functools.partial(jnp.einsum, precision="highest")
    m = mask.astype(jnp.float32)[:, :, None]
    h = jnp.maximum(hp("btd,dh->bth", x, params["w_in"]) + params["b_in"], 0.0)
    z = h * m
    K = params["w_conv"].shape[0]
    pad = (K - 1) // 2
    T = x.shape[1]
    zp = jnp.pad(z, ((0, 0), (pad, pad), (0, 0)))
    c = sum(hp("bti,io->bto", zp[:, j:j + T, :], params["w_conv"][j])
            for j in range(K)) + params["b_conv"]
    c1 = jnp.maximum(c, 0.0) * m
    fc_in = jnp.max(c1, axis=1)
    fch = jnp.maximum(hp("bh,ho->bo", fc_in, params["w_fc"]) + params["b_fc"], 0.0)
    mu = hp("bh,ho->bo", fch, params["w_mu"]) + params["b_mu"]
    lv = hp("bh,ho->bo", fch, params["w_lv"]) + params["b_lv"]
    return mu, lv


def init_params(key, word_vec_size, hidden_size, kernel_size):
    """PyTorch-style uniform(-1/sqrt(fan_in), 1/sqrt(fan_in)) init.
    Linear weights stored as (in, out); Conv1d weights stored as (K, in, out)
    (i.e. PyTorch's (out, in, K) permuted to tap-major)."""
    ks = jax.random.split(key, 12)

    def u(k, shape, fan_in):
        b = 1.0 / np.sqrt(fan_in)
        return jax.random.uniform(k, shape, jnp.float32, -b, b)

    D, H, K = word_vec_size, hidden_size, kernel_size
    return {
        "w_in":   u(ks[0], (D, H), D),
        "b_in":   u(ks[1], (1, H), D),
        "w_conv": u(ks[2], (K, H, H), H * K),
        "b_conv": u(ks[3], (1, H), H * K),
        "w_fc":   u(ks[4], (H, H), H),
        "b_fc":   u(ks[5], (1, H), H),
        "w_mu":   u(ks[6], (H, H), H),
        "b_mu":   u(ks[7], (1, H), H),
        "w_lv":   u(ks[8], (H, H), H),
        "b_lv":   u(ks[9], (1, H), H),
    }


if __name__ == "__main__":
    def run_case(name, key, B, T, D, H, K, rows_per_tile):
        k_param, k_x, k_len = jax.random.split(key, 3)
        params = init_params(k_param, D, H, K)
        x = jax.random.normal(k_x, (B, T, D), jnp.float32)
        lengths = jax.random.randint(k_len, (B,), 1, T + 1)
        mask = (jnp.arange(T)[None, :] < lengths[:, None]).astype(jnp.float32)

        mu, log_sigma, _ = cnn_model_bypass_forward(
            x, mask, params, rows_per_tile=rows_per_tile)
        jax.block_until_ready((mu, log_sigma))

        mu_ref, lv_ref = reference_forward(x, mask, params)
        np.testing.assert_allclose(np.asarray(mu), np.asarray(mu_ref),
                                   rtol=2e-2, atol=2e-2, err_msg=name)
        np.testing.assert_allclose(np.asarray(log_sigma), np.asarray(lv_ref),
                                   rtol=2e-2, atol=2e-2, err_msg=name)

    root = jax.random.PRNGKey(0)
    k1, k2 = jax.random.split(root)
    # canonical small shape: single batch tile (grid of 1)
    run_case("small", k1, B=2, T=8, D=32, H=32, K=3, rows_per_tile=2048)
    # non-aligned B/T/H + multi-tile grid path (batch/time/hidden padding)
    run_case("tiled", k2, B=12, T=13, D=48, H=100, K=5, rows_per_tile=8)

    print("KERNEL_OK")
</pallas_src>

<mosaic_0001>
module attributes {stable_mosaic.version = 11 : i64} {
  func.func @_cnn_bypass_kernel(%arg0: i32, %arg1: memref<2x1xi32, #tpu.memory_space<vmem>>, %arg2: memref<2x16x32xbf16, #tpu.memory_space<vmem>>, %arg3: memref<32x128xbf16, #tpu.memory_space<vmem>>, %arg4: memref<1x128xf32, #tpu.memory_space<vmem>>, %arg5: memref<3x128x128xbf16, #tpu.memory_space<vmem>>, %arg6: memref<1x128xf32, #tpu.memory_space<vmem>>, %arg7: memref<128x128xbf16, #tpu.memory_space<vmem>>, %arg8: memref<1x128xf32, #tpu.memory_space<vmem>>, %arg9: memref<128x256xbf16, #tpu.memory_space<vmem>>, %arg10: memref<1x256xf32, #tpu.memory_space<vmem>>, %arg11: memref<2x256xf32, #tpu.memory_space<vmem>>) attributes {dimension_semantics = [#tpu.dimension_semantics<parallel>], iteration_bounds = array<i64: 1>, scalar_prefetch = 0 : i64, scratch_operands = 0 : i64, tpu.core_type = #tpu.core_type<tc>, window_params = [{transform_indices = @transform_0, window_bounds = array<i64: 2, 1>}, {transform_indices = @transform_1, window_bounds = array<i64: 2, 16, 32>}, {pipeline_mode = #tpu.pipeline_mode<synchronous>, transform_indices = @transform_2, window_bounds = array<i64: 32, 128>}, {pipeline_mode = #tpu.pipeline_mode<synchronous>, transform_indices = @transform_3, window_bounds = array<i64: 1, 128>}, {pipeline_mode = #tpu.pipeline_mode<synchronous>, transform_indices = @transform_4, window_bounds = array<i64: 3, 128, 128>}, {pipeline_mode = #tpu.pipeline_mode<synchronous>, transform_indices = @transform_5, window_bounds = array<i64: 1, 128>}, {pipeline_mode = #tpu.pipeline_mode<synchronous>, transform_indices = @transform_6, window_bounds = array<i64: 128, 128>}, {pipeline_mode = #tpu.pipeline_mode<synchronous>, transform_indices = @transform_7, window_bounds = array<i64: 1, 128>}, {pipeline_mode = #tpu.pipeline_mode<synchronous>, transform_indices = @transform_8, window_bounds = array<i64: 128, 256>}, {pipeline_mode = #tpu.pipeline_mode<synchronous>, transform_indices = @transform_9, window_bounds = array<i64: 1, 256>}, {transform_indices = @transform_10, window_bounds = array<i64: 2, 256>}]} {
    %c0 = arith.constant 0 : index
    %c0_0 = arith.constant 0 : index
    %0 = vector.load %arg1[%c0, %c0_0] : memref<2x1xi32, #tpu.memory_space<vmem>>, vector<2x1xi32>
    %1 = vector.shape_cast %0 : vector<2x1xi32> to vector<2x1x1xi32>
    %2 = tpu.iota {dimensions = array<i32: 1>} : vector<2x16x1xi32>
    %3 = vector.broadcast %1 : vector<2x1x1xi32> to vector<2x16x1xi32>
    %4 = arith.cmpi slt, %2, %3 : vector<2x16x1xi32>
    %5 = arith.extui %4 : vector<2x16x1xi1> to vector<2x16x1xi32>
    %6 = arith.sitofp %5 : vector<2x16x1xi32> to vector<2x16x1xf32>
    %c0_1 = arith.constant 0 : index
    %c0_2 = arith.constant 0 : index
    %c0_3 = arith.constant 0 : index
    %7 = vector.load %arg2[%c0_1, %c0_2, %c0_3] : memref<2x16x32xbf16, #tpu.memory_space<vmem>>, vector<2x16x32xbf16>
    %8 = vector.shape_cast %7 : vector<2x16x32xbf16> to vector<32x32xbf16>
    %c0_4 = arith.constant 0 : index
    %c0_5 = arith.constant 0 : index
    %9 = vector.load %arg3[%c0_4, %c0_5] : memref<32x128xbf16, #tpu.memory_space<vmem>>, vector<32x128xbf16>
    %cst = arith.constant dense<0.000000e+00> : vector<32x128xf32>
    %10 = tpu.matmul %8, %9, %cst {dimension_numbers = #tpu.dot_dimension_numbers<[1], [0], [0], [1], [0, 0, 1, 1], [], []>} : vector<32x32xbf16>, vector<32x128xbf16>, vector<32x128xf32> -> vector<32x128xf32>
    %c0_6 = arith.constant 0 : index
    %c0_7 = arith.constant 0 : index
    %11 = vector.load %arg4[%c0_6, %c0_7] : memref<1x128xf32, #tpu.memory_space<vmem>>, vector<1x128xf32>
    %12 = vector.broadcast %11 : vector<1x128xf32> to vector<32x128xf32>
    %13 = arith.addf %10, %12 : vector<32x128xf32>
    %cst_8 = arith.constant 0.000000e+00 : f32
    %14 = vector.broadcast %cst_8 : f32 to vector<32x128xf32>
    %15 = arith.maximumf %13, %14 : vector<32x128xf32>
    %16 = vector.shape_cast %15 : vector<32x128xf32> to vector<2x16x128xf32>
    %17 = vector.broadcast %6 : vector<2x16x1xf32> to vector<2x16x128xf32>
    %18 = arith.mulf %16, %17 : vector<2x16x128xf32>
    %19 = vector.shape_cast %18 : vector<2x16x128xf32> to vector<32x128xf32>
    %20 = arith.truncf %19 : vector<32x128xf32> to vector<32x128xbf16>
    %c0_9 = arith.constant 0 : index
    %c0_10 = arith.constant 0 : index
    %c0_11 = arith.constant 0 : index
    %21 = vector.load %arg5[%c0_9, %c0_10, %c0_11] : memref<3x128x128xbf16, #tpu.memory_space<vmem>>, vector<1x128x128xbf16>
    %22 = vector.shape_cast %21 : vector<1x128x128xbf16> to vector<128x128xbf16>
    %cst_12 = arith.constant dense<0.000000e+00> : vector<32x128xf32>
    %23 = tpu.matmul %20, %22, %cst_12 {dimension_numbers = #tpu.dot_dimension_numbers<[1], [0], [0], [1], [0, 0, 1, 1], [], []>} : vector<32x128xbf16>, vector<128x128xbf16>, vector<32x128xf32> -> vector<32x128xf32>
    %c1_i32 = arith.constant 1 : i32
    %24 = tpu.dynamic_rotate %23 by %c1_i32 dim 0 : vector<32x128xf32>, i32 -> vector<32x128xf32>
    %c1 = arith.constant 1 : index
    %c0_13 = arith.constant 0 : index
    %c0_14 = arith.constant 0 : index
    %25 = vector.load %arg5[%c1, %c0_13, %c0_14] : memref<3x128x128xbf16, #tpu.memory_space<vmem>>, vector<1x128x128xbf16>
    %26 = vector.shape_cast %25 : vector<1x128x128xbf16> to vector<128x128xbf16>
    %cst_15 = arith.constant dense<0.000000e+00> : vector<32x128xf32>
    %27 = tpu.matmul %20, %26, %cst_15 {dimension_numbers = #tpu.dot_dimension_numbers<[1], [0], [0], [1], [0, 0, 1, 1], [], []>} : vector<32x128xbf16>, vector<128x128xbf16>, vector<32x128xf32> -> vector<32x128xf32>
    %28 = arith.addf %24, %27 : vector<32x128xf32>
    %c2 = arith.constant 2 : index
    %c0_16 = arith.constant 0 : index
    %c0_17 = arith.constant 0 : index
    %29 = vector.load %arg5[%c2, %c0_16, %c0_17] : memref<3x128x128xbf16, #tpu.memory_space<vmem>>, vector<1x128x128xbf16>
    %30 = vector.shape_cast %29 : vector<1x128x128xbf16> to vector<128x128xbf16>
    %cst_18 = arith.constant dense<0.000000e+00> : vector<32x128xf32>
    %31 = tpu.matmul %20, %30, %cst_18 {dimension_numbers = #tpu.dot_dimension_numbers<[1], [0], [0], [1], [0, 0, 1, 1], [], []>} : vector<32x128xbf16>, vector<128x128xbf16>, vector<32x128xf32> -> vector<32x128xf32>
    %c31_i32 = arith.constant 31 : i32
    %32 = tpu.dynamic_rotate %31 by %c31_i32 dim 0 : vector<32x128xf32>, i32 -> vector<32x128xf32>
    %33 = arith.addf %28, %32 : vector<32x128xf32>
    %c0_19 = arith.constant 0 : index
    %c0_20 = arith.constant 0 : index
    %34 = vector.load %arg6[%c0_19, %c0_20] : memref<1x128xf32, #tpu.memory_space<vmem>>, vector<1x128xf32>
    %35 = vector.broadcast %34 : vector<1x128xf32> to vector<32x128xf32>
    %36 = arith.addf %33, %35 : vector<32x128xf32>
    %cst_21 = arith.constant 0.000000e+00 : f32
    %37 = vector.broadcast %cst_21 : f32 to vector<32x128xf32>
    %38 = arith.maximumf %36, %37 : vector<32x128xf32>
    %39 = vector.shape_cast %38 : vector<32x128xf32> to vector<2x16x128xf32>
    %40 = vector.broadcast %6 : vector<2x16x1xf32> to vector<2x16x128xf32>
    %41 = arith.mulf %39, %40 : vector<2x16x128xf32>
    %cst_22 = arith.constant dense<0xFF800000> : vector<2x128xf32>
    %42 = vector.multi_reduction <maximumf>, %41, %cst_22 [1] : vector<2x16x128xf32> to vector<2x128xf32>
    %43 = arith.truncf %42 : vector<2x128xf32> to vector<2x128xbf16>
    %c0_23 = arith.constant 0 : index
    %c0_24 = arith.constant 0 : index
    %44 = vector.load %arg7[%c0_23, %c0_24] : memref<128x128xbf16, #tpu.memory_space<vmem>>, vector<128x128xbf16>
    %cst_25 = arith.constant dense<0.000000e+00> : vector<2x128xf32>
    %45 = tpu.matmul %43, %44, %cst_25 {dimension_numbers = #tpu.dot_dimension_numbers<[1], [0], [0], [1], [0, 0, 1, 1], [], []>} : vector<2x128xbf16>, vector<128x128xbf16>, vector<2x128xf32> -> vector<2x128xf32>
    %c0_26 = arith.constant 0 : index
    %c0_27 = arith.constant 0 : index
    %46 = vector.load %arg8[%c0_26, %c0_27] : memref<1x128xf32, #tpu.memory_space<vmem>>, vector<1x128xf32>
    %47 = vector.broadcast %46 : vector<1x128xf32> to vector<2x128xf32>
    %48 = arith.addf %45, %47 : vector<2x128xf32>
    %cst_28 = arith.constant 0.000000e+00 : f32
    %49 = vector.broadcast %cst_28 : f32 to vector<2x128xf32>
    %50 = arith.maximumf %48, %49 : vector<2x128xf32>
    %51 = arith.truncf %50 : vector<2x128xf32> to vector<2x128xbf16>
    %c0_29 = arith.constant 0 : index
    %c0_30 = arith.constant 0 : index
    %52 = vector.load %arg9[%c0_29, %c0_30] : memref<128x256xbf16, #tpu.memory_space<vmem>>, vector<128x256xbf16>
    %cst_31 = arith.constant dense<0.000000e+00> : vector<2x256xf32>
    %53 = tpu.matmul %51, %52, %cst_31 {dimension_numbers = #tpu.dot_dimension_numbers<[1], [0], [0], [1], [0, 0, 1, 1], [], []>} : vector<2x128xbf16>, vector<128x256xbf16>, vector<2x256xf32> -> vector<2x256xf32>
    %c0_32 = arith.constant 0 : index
    %c0_33 = arith.constant 0 : index
    %54 = vector.load %arg10[%c0_32, %c0_33] : memref<1x256xf32, #tpu.memory_space<vmem>>, vector<1x256xf32>
    %55 = vector.broadcast %54 : vector<1x256xf32> to vector<2x256xf32>
    %56 = arith.addf %53, %55 : vector<2x256xf32>
    %c0_34 = arith.constant 0 : index
    %c0_35 = arith.constant 0 : index
    %57 = vector.load %arg11[%c0_34, %c0_35] : memref<2x256xf32, #tpu.memory_space<vmem>>, vector<2x256xf32>
    tpu.vector_store %arg11[%c0_34, %c0_35], %56 {strides = array<i32>} : memref<2x256xf32, #tpu.memory_space<vmem>>, vector<2x256xf32>,
    return
  }
  func.func @transform_0(%arg0: i32) -> (i32, i32) {
    %c0_i32 = arith.constant 0 : i32
    %c0_i32_0 = arith.constant 0 : i32
    return %arg0, %c0_i32 : i32, i32
  }
  func.func @transform_1(%arg0: i32) -> (i32, i32, i32) {
    %c0_i32 = arith.constant 0 : i32
    %c0_i32_0 = arith.constant 0 : i32
    %c0_i32_1 = arith.constant 0 : i32
    return %arg0, %c0_i32, %c0_i32_0 : i32, i32, i32
  }
  func.func @transform_2(%arg0: i32) -> (i32, i32) {
    %c0_i32 = arith.constant 0 : i32
    %c0_i32_0 = arith.constant 0 : i32
    %c0_i32_1 = arith.constant 0 : i32
    return %c0_i32, %c0_i32_0 : i32, i32
  }
  func.func @transform_3(%arg0: i32) -> (i32, i32) {
    %c0_i32 = arith.constant 0 : i32
    %c0_i32_0 = arith.constant 0 : i32
    %c0_i32_1 = arith.constant 0 : i32
    return %c0_i32, %c0_i32_0 : i32, i32
  }
  func.func @transform_4(%arg0: i32) -> (i32, i32, i32) {
    %c0_i32 = arith.constant 0 : i32
    %c0_i32_0 = arith.constant 0 : i32
    %c0_i32_1 = arith.constant 0 : i32
    %c0_i32_2 = arith.constant 0 : i32
    return %c0_i32, %c0_i32_0, %c0_i32_1 : i32, i32, i32
  }
  func.func @transform_5(%arg0: i32) -> (i32, i32) {
    %c0_i32 = arith.constant 0 : i32
    %c0_i32_0 = arith.constant 0 : i32
    %c0_i32_1 = arith.constant 0 : i32
    return %c0_i32, %c0_i32_0 : i32, i32
  }
  func.func @transform_6(%arg0: i32) -> (i32, i32) {
    %c0_i32 = arith.constant 0 : i32
    %c0_i32_0 = arith.constant 0 : i32
    %c0_i32_1 = arith.constant 0 : i32
    return %c0_i32, %c0_i32_0 : i32, i32
  }
  func.func @transform_7(%arg0: i32) -> (i32, i32) {
    %c0_i32 = arith.constant 0 : i32
    %c0_i32_0 = arith.constant 0 : i32
    %c0_i32_1 = arith.constant 0 : i32
    return %c0_i32, %c0_i32_0 : i32, i32
  }
  func.func @transform_8(%arg0: i32) -> (i32, i32) {
    %c0_i32 = arith.constant 0 : i32
    %c0_i32_0 = arith.constant 0 : i32
    %c0_i32_1 = arith.constant 0 : i32
    return %c0_i32, %c0_i32_0 : i32, i32
  }
  func.func @transform_9(%arg0: i32) -> (i32, i32) {
    %c0_i32 = arith.constant 0 : i32
    %c0_i32_0 = arith.constant 0 : i32
    %c0_i32_1 = arith.constant 0 : i32
    return %c0_i32, %c0_i32_0 : i32, i32
  }
  func.func @transform_10(%arg0: i32) -> (i32, i32) {
    %c0_i32 = arith.constant 0 : i32
    %c0_i32_0 = arith.constant 0 : i32
    return %arg0, %c0_i32 : i32, i32
  }
}

module attributes {stable_mosaic.version = 11 : i64} {
  func.func @_cnn_bypass_kernel(%arg0: i32, %arg1: memref<2x1xi32, #tpu.memory_space<vmem>>, %arg2: memref<2x16x32xbf16, #tpu.memory_space<vmem>>, %arg3: memref<32x128xbf16, #tpu.memory_space<vmem>>, %arg4: memref<1x128xf32, #tpu.memory_space<vmem>>, %arg5: memref<3x128x128xbf16, #tpu.memory_space<vmem>>, %arg6: memref<1x128xf32, #tpu.memory_space<vmem>>, %arg7: memref<128x128xbf16, #tpu.memory_space<vmem>>, %arg8: memref<1x128xf32, #tpu.memory_space<vmem>>, %arg9: memref<128x256xbf16, #tpu.memory_space<vmem>>, %arg10: memref<1x256xf32, #tpu.memory_space<vmem>>, %arg11: memref<2x256xf32, #tpu.memory_space<vmem>>) attributes {dimension_semantics = [#tpu.dimension_semantics<parallel>], iteration_bounds = array<i64: 1>, scalar_prefetch = 0 : i64, scratch_operands = 0 : i64, tpu.core_type = #tpu.core_type<tc>, window_params = [{transform_indices = @transform_0, window_bounds = array<i64: 2, 1>}, {transform_indices = @transform_1, window_bounds = array<i64: 2, 16, 32>}, {pipeline_mode = #tpu.pipeline_mode<synchronous>, transform_indices = @transform_2, window_bounds = array<i64: 32, 128>}, {pipeline_mode = #tpu.pipeline_mode<synchronous>, transform_indices = @transform_3, window_bounds = array<i64: 1, 128>}, {pipeline_mode = #tpu.pipeline_mode<synchronous>, transform_indices = @transform_4, window_bounds = array<i64: 3, 128, 128>}, {pipeline_mode = #tpu.pipeline_mode<synchronous>, transform_indices = @transform_5, window_bounds = array<i64: 1, 128>}, {pipeline_mode = #tpu.pipeline_mode<synchronous>, transform_indices = @transform_6, window_bounds = array<i64: 128, 128>}, {pipeline_mode = #tpu.pipeline_mode<synchronous>, transform_indices = @transform_7, window_bounds = array<i64: 1, 128>}, {pipeline_mode = #tpu.pipeline_mode<synchronous>, transform_indices = @transform_8, window_bounds = array<i64: 128, 256>}, {pipeline_mode = #tpu.pipeline_mode<synchronous>, transform_indices = @transform_9, window_bounds = array<i64: 1, 256>}, {transform_indices = @transform_10, window_bounds = array<i64: 2, 256>}]} {
    %c0 = arith.constant 0 : index
    %c0_0 = arith.constant 0 : index
    %0 = vector.load %arg1[%c0, %c0_0] : memref<2x1xi32, #tpu.memory_space<vmem>>, vector<2x1xi32>
    %1 = vector.shape_cast %0 : vector<2x1xi32> to vector<2x1x1xi32>
    %2 = tpu.iota {dimensions = array<i32: 1>} : vector<2x16x1xi32>
    %3 = vector.broadcast %1 : vector<2x1x1xi32> to vector<2x16x1xi32>
    %4 = arith.cmpi slt, %2, %3 : vector<2x16x1xi32>
    %5 = arith.extui %4 : vector<2x16x1xi1> to vector<2x16x1xi32>
    %6 = arith.sitofp %5 : vector<2x16x1xi32> to vector<2x16x1xf32>
    %c0_1 = arith.constant 0 : index
    %c0_2 = arith.constant 0 : index
    %c0_3 = arith.constant 0 : index
    %7 = vector.load %arg2[%c0_1, %c0_2, %c0_3] : memref<2x16x32xbf16, #tpu.memory_space<vmem>>, vector<2x16x32xbf16>
    %8 = vector.shape_cast %7 : vector<2x16x32xbf16> to vector<32x32xbf16>
    %c0_4 = arith.constant 0 : index
    %c0_5 = arith.constant 0 : index
    %9 = vector.load %arg3[%c0_4, %c0_5] : memref<32x128xbf16, #tpu.memory_space<vmem>>, vector<32x128xbf16>
    %cst = arith.constant dense<0.000000e+00> : vector<32x128xf32>
    %10 = tpu.matmul %8, %9, %cst {dimension_numbers = #tpu.dot_dimension_numbers<[1], [0], [0], [1], [0, 0, 1, 1], [], []>} : vector<32x32xbf16>, vector<32x128xbf16>, vector<32x128xf32> -> vector<32x128xf32>
    %c0_6 = arith.constant 0 : index
    %c0_7 = arith.constant 0 : index
    %11 = vector.load %arg4[%c0_6, %c0_7] : memref<1x128xf32, #tpu.memory_space<vmem>>, vector<1x128xf32>
    %12 = vector.broadcast %11 : vector<1x128xf32> to vector<32x128xf32>
    %13 = arith.addf %10, %12 : vector<32x128xf32>
    %cst_8 = arith.constant 0.000000e+00 : f32
    %14 = vector.broadcast %cst_8 : f32 to vector<32x128xf32>
    %15 = arith.maximumf %13, %14 : vector<32x128xf32>
    %16 = vector.shape_cast %15 : vector<32x128xf32> to vector<2x16x128xf32>
    %17 = vector.broadcast %6 : vector<2x16x1xf32> to vector<2x16x128xf32>
    %18 = arith.mulf %16, %17 : vector<2x16x128xf32>
    %19 = vector.shape_cast %18 : vector<2x16x128xf32> to vector<32x128xf32>
    %20 = arith.truncf %19 : vector<32x128xf32> to vector<32x128xbf16>
    %c0_9 = arith.constant 0 : index
    %c0_10 = arith.constant 0 : index
    %c0_11 = arith.constant 0 : index
    %21 = vector.load %arg5[%c0_9, %c0_10, %c0_11] : memref<3x128x128xbf16, #tpu.memory_space<vmem>>, vector<1x128x128xbf16>
    %22 = vector.shape_cast %21 : vector<1x128x128xbf16> to vector<128x128xbf16>
    %cst_12 = arith.constant dense<0.000000e+00> : vector<32x128xf32>
    %23 = tpu.matmul %20, %22, %cst_12 {dimension_numbers = #tpu.dot_dimension_numbers<[1], [0], [0], [1], [0, 0, 1, 1], [], []>} : vector<32x128xbf16>, vector<128x128xbf16>, vector<32x128xf32> -> vector<32x128xf32>
    %c1_i32 = arith.constant 1 : i32
    %24 = tpu.dynamic_rotate %23 by %c1_i32 dim 0 : vector<32x128xf32>, i32 -> vector<32x128xf32>
    %c1 = arith.constant 1 : index
    %c0_13 = arith.constant 0 : index
    %c0_14 = arith.constant 0 : index
    %25 = vector.load %arg5[%c1, %c0_13, %c0_14] : memref<3x128x128xbf16, #tpu.memory_space<vmem>>, vector<1x128x128xbf16>
    %26 = vector.shape_cast %25 : vector<1x128x128xbf16> to vector<128x128xbf16>
    %cst_15 = arith.constant dense<0.000000e+00> : vector<32x128xf32>
    %27 = tpu.matmul %20, %26, %cst_15 {dimension_numbers = #tpu.dot_dimension_numbers<[1], [0], [0], [1], [0, 0, 1, 1], [], []>} : vector<32x128xbf16>, vector<128x128xbf16>, vector<32x128xf32> -> vector<32x128xf32>
    %28 = arith.addf %24, %27 : vector<32x128xf32>
    %c2 = arith.constant 2 : index
    %c0_16 = arith.constant 0 : index
    %c0_17 = arith.constant 0 : index
    %29 = vector.load %arg5[%c2, %c0_16, %c0_17] : memref<3x128x128xbf16, #tpu.memory_space<vmem>>, vector<1x128x128xbf16>
    %30 = vector.shape_cast %29 : vector<1x128x128xbf16> to vector<128x128xbf16>
    %cst_18 = arith.constant dense<0.000000e+00> : vector<32x128xf32>
    %31 = tpu.matmul %20, %30, %cst_18 {dimension_numbers = #tpu.dot_dimension_numbers<[1], [0], [0], [1], [0, 0, 1, 1], [], []>} : vector<32x128xbf16>, vector<128x128xbf16>, vector<32x128xf32> -> vector<32x128xf32>
    %c31_i32 = arith.constant 31 : i32
    %32 = tpu.dynamic_rotate %31 by %c31_i32 dim 0 : vector<32x128xf32>, i32 -> vector<32x128xf32>
    %33 = arith.addf %28, %32 : vector<32x128xf32>
    %c0_19 = arith.constant 0 : index
    %c0_20 = arith.constant 0 : index
    %34 = vector.load %arg6[%c0_19, %c0_20] : memref<1x128xf32, #tpu.memory_space<vmem>>, vector<1x128xf32>
    %35 = vector.broadcast %34 : vector<1x128xf32> to vector<32x128xf32>
    %36 = arith.addf %33, %35 : vector<32x128xf32>
    %cst_21 = arith.constant 0.000000e+00 : f32
    %37 = vector.broadcast %cst_21 : f32 to vector<32x128xf32>
    %38 = arith.maximumf %36, %37 : vector<32x128xf32>
    %39 = vector.shape_cast %38 : vector<32x128xf32> to vector<2x16x128xf32>
    %40 = vector.broadcast %6 : vector<2x16x1xf32> to vector<2x16x128xf32>
    %41 = arith.mulf %39, %40 : vector<2x16x128xf32>
    %cst_22 = arith.constant dense<0xFF800000> : vector<2x128xf32>
    %42 = vector.multi_reduction <maximumf>, %41, %cst_22 [1] : vector<2x16x128xf32> to vector<2x128xf32>
    %43 = arith.truncf %42 : vector<2x128xf32> to vector<2x128xbf16>
    %c0_23 = arith.constant 0 : index
    %c0_24 = arith.constant 0 : index
    %44 = vector.load %arg7[%c0_23, %c0_24] : memref<128x128xbf16, #tpu.memory_space<vmem>>, vector<128x128xbf16>
    %cst_25 = arith.constant dense<0.000000e+00> : vector<2x128xf32>
    %45 = tpu.matmul %43, %44, %cst_25 {dimension_numbers = #tpu.dot_dimension_numbers<[1], [0], [0], [1], [0, 0, 1, 1], [], []>} : vector<2x128xbf16>, vector<128x128xbf16>, vector<2x128xf32> -> vector<2x128xf32>
    %c0_26 = arith.constant 0 : index
    %c0_27 = arith.constant 0 : index
    %46 = vector.load %arg8[%c0_26, %c0_27] : memref<1x128xf32, #tpu.memory_space<vmem>>, vector<1x128xf32>
    %47 = vector.broadcast %46 : vector<1x128xf32> to vector<2x128xf32>
    %48 = arith.addf %45, %47 : vector<2x128xf32>
    %cst_28 = arith.constant 0.000000e+00 : f32
    %49 = vector.broadcast %cst_28 : f32 to vector<2x128xf32>
    %50 = arith.maximumf %48, %49 : vector<2x128xf32>
    %51 = arith.truncf %50 : vector<2x128xf32> to vector<2x128xbf16>
    %c0_29 = arith.constant 0 : index
    %c0_30 = arith.constant 0 : index
    %52 = vector.load %arg9[%c0_29, %c0_30] : memref<128x256xbf16, #tpu.memory_space<vmem>>, vector<128x256xbf16>
    %cst_31 = arith.constant dense<0.000000e+00> : vector<2x256xf32>
    %53 = tpu.matmul %51, %52, %cst_31 {dimension_numbers = #tpu.dot_dimension_numbers<[1], [0], [0], [1], [0, 0, 1, 1], [], []>} : vector<2x128xbf16>, vector<128x256xbf16>, vector<2x256xf32> -> vector<2x256xf32>
    %c0_32 = arith.constant 0 : index
    %c0_33 = arith.constant 0 : index
    %54 = vector.load %arg10[%c0_32, %c0_33] : memref<1x256xf32, #tpu.memory_space<vmem>>, vector<1x256xf32>
    %55 = vector.broadcast %54 : vector<1x256xf32> to vector<2x256xf32>
    %56 = arith.addf %53, %55 : vector<2x256xf32>
    %c0_34 = arith.constant 0 : index
    %c0_35 = arith.constant 0 : index
    %57 = vector.load %arg11[%c0_34, %c0_35] : memref<2x256xf32, #tpu.memory_space<vmem>>, vector<2x256xf32>
    tpu.vector_store %arg11[%c0_34, %c0_35], %56 {strides = array<i32>} : memref<2x256xf32, #tpu.memory_space<vmem>>, vector<2x256xf32>,
    return
  }
  func.func @transform_0(%arg0: i32) -> (i32, i32) {
    %c0_i32 = arith.constant 0 : i32
    %c0_i32_0 = arith.constant 0 : i32
    return %arg0, %c0_i32 : i32, i32
  }
  func.func @transform_1(%arg0: i32) -> (i32, i32, i32) {
    %c0_i32 = arith.constant 0 : i32
    %c0_i32_0 = arith.constant 0 : i32
    %c0_i32_1 = arith.constant 0 : i32
    return %arg0, %c0_i32, %c0_i32_0 : i32, i32, i32
  }
  func.func @transform_2(%arg0: i32) -> (i32, i32) {
    %c0_i32 = arith.constant 0 : i32
    %c0_i32_0 = arith.constant 0 : i32
    %c0_i32_1 = arith.constant 0 : i32
    return %c0_i32, %c0_i32_0 : i32, i32
  }
  func.func @transform_3(%arg0: i32) -> (i32, i32) {
    %c0_i32 = arith.constant 0 : i32
    %c0_i32_0 = arith.constant 0 : i32
    %c0_i32_1 = arith.constant 0 : i32
    return %c0_i32, %c0_i32_0 : i32, i32
  }
  func.func @transform_4(%arg0: i32) -> (i32, i32, i32) {
    %c0_i32 = arith.constant 0 : i32
    %c0_i32_0 = arith.constant 0 : i32
    %c0_i32_1 = arith.constant 0 : i32
    %c0_i32_2 = arith.constant 0 : i32
    return %c0_i32, %c0_i32_0, %c0_i32_1 : i32, i32, i32
  }
  func.func @transform_5(%arg0: i32) -> (i32, i32) {
    %c0_i32 = arith.constant 0 : i32
    %c0_i32_0 = arith.constant 0 : i32
    %c0_i32_1 = arith.constant 0 : i32
    return %c0_i32, %c0_i32_0 : i32, i32
  }
  func.func @transform_6(%arg0: i32) -> (i32, i32) {
    %c0_i32 = arith.constant 0 : i32
    %c0_i32_0 = arith.constant 0 : i32
    %c0_i32_1 = arith.constant 0 : i32
    return %c0_i32, %c0_i32_0 : i32, i32
  }
  func.func @transform_7(%arg0: i32) -> (i32, i32) {
    %c0_i32 = arith.constant 0 : i32
    %c0_i32_0 = arith.constant 0 : i32
    %c0_i32_1 = arith.constant 0 : i32
    return %c0_i32, %c0_i32_0 : i32, i32
  }
  func.func @transform_8(%arg0: i32) -> (i32, i32) {
    %c0_i32 = arith.constant 0 : i32
    %c0_i32_0 = arith.constant 0 : i32
    %c0_i32_1 = arith.constant 0 : i32
    return %c0_i32, %c0_i32_0 : i32, i32
  }
  func.func @transform_9(%arg0: i32) -> (i32, i32) {
    %c0_i32 = arith.constant 0 : i32
    %c0_i32_0 = arith.constant 0 : i32
    %c0_i32_1 = arith.constant 0 : i32
    return %c0_i32, %c0_i32_0 : i32, i32
  }
  func.func @transform_10(%arg0: i32) -> (i32, i32) {
    %c0_i32 = arith.constant 0 : i32
    %c0_i32_0 = arith.constant 0 : i32
    return %arg0, %c0_i32 : i32, i32
  }
}

module attributes {stable_mosaic.version = 11 : i64} {
  func.func @_cnn_bypass_kernel(%arg0: i32, %arg1: memref<2x1xi32, #tpu.memory_space<vmem>>, %arg2: memref<2x16x32xbf16, #tpu.memory_space<vmem>>, %arg3: memref<32x128xbf16, #tpu.memory_space<vmem>>, %arg4: memref<1x128xf32, #tpu.memory_space<vmem>>, %arg5: memref<3x128x128xbf16, #tpu.memory_space<vmem>>, %arg6: memref<1x128xf32, #tpu.memory_space<vmem>>, %arg7: memref<128x128xbf16, #tpu.memory_space<vmem>>, %arg8: memref<1x128xf32, #tpu.memory_space<vmem>>, %arg9: memref<128x256xbf16, #tpu.memory_space<vmem>>, %arg10: memref<1x256xf32, #tpu.memory_space<vmem>>, %arg11: memref<2x256xf32, #tpu.memory_space<vmem>>, %arg12: memref<2x18x128xf32, #tpu.memory_space<vmem>>) attributes {dimension_semantics = [#tpu.dimension_semantics<parallel>], iteration_bounds = array<i64: 1>, scalar_prefetch = 0 : i64, scratch_operands = 1 : i64, tpu.core_type = #tpu.core_type<tc>, window_params = [{transform_indices = @transform_0, window_bounds = array<i64: 2, 1>}, {transform_indices = @transform_1, window_bounds = array<i64: 2, 16, 32>}, {pipeline_mode = #tpu.pipeline_mode<synchronous>, transform_indices = @transform_2, window_bounds = array<i64: 32, 128>}, {pipeline_mode = #tpu.pipeline_mode<synchronous>, transform_indices = @transform_3, window_bounds = array<i64: 1, 128>}, {pipeline_mode = #tpu.pipeline_mode<synchronous>, transform_indices = @transform_4, window_bounds = array<i64: 3, 128, 128>}, {pipeline_mode = #tpu.pipeline_mode<synchronous>, transform_indices = @transform_5, window_bounds = array<i64: 1, 128>}, {pipeline_mode = #tpu.pipeline_mode<synchronous>, transform_indices = @transform_6, window_bounds = array<i64: 128, 128>}, {pipeline_mode = #tpu.pipeline_mode<synchronous>, transform_indices = @transform_7, window_bounds = array<i64: 1, 128>}, {pipeline_mode = #tpu.pipeline_mode<synchronous>, transform_indices = @transform_8, window_bounds = array<i64: 128, 256>}, {pipeline_mode = #tpu.pipeline_mode<synchronous>, transform_indices = @transform_9, window_bounds = array<i64: 1, 256>}, {transform_indices = @transform_10, window_bounds = array<i64: 2, 256>}]} {
    %c0 = arith.constant 0 : index
    %c0_0 = arith.constant 0 : index
    %0 = vector.load %arg1[%c0, %c0_0] : memref<2x1xi32, #tpu.memory_space<vmem>>, vector<2x1xi32>
    %1 = vector.shape_cast %0 : vector<2x1xi32> to vector<2x1x1xi32>
    %2 = tpu.iota {dimensions = array<i32: 1>} : vector<2x16x1xi32>
    %3 = vector.broadcast %1 : vector<2x1x1xi32> to vector<2x16x1xi32>
    %4 = arith.cmpi slt, %2, %3 : vector<2x16x1xi32>
    %5 = arith.extui %4 : vector<2x16x1xi1> to vector<2x16x1xi32>
    %6 = arith.sitofp %5 : vector<2x16x1xi32> to vector<2x16x1xf32>
    %c0_1 = arith.constant 0 : index
    %c0_2 = arith.constant 0 : index
    %c0_3 = arith.constant 0 : index
    %7 = vector.load %arg2[%c0_1, %c0_2, %c0_3] : memref<2x16x32xbf16, #tpu.memory_space<vmem>>, vector<2x16x32xbf16>
    %8 = vector.shape_cast %7 : vector<2x16x32xbf16> to vector<32x32xbf16>
    %c0_4 = arith.constant 0 : index
    %c0_5 = arith.constant 0 : index
    %9 = vector.load %arg3[%c0_4, %c0_5] : memref<32x128xbf16, #tpu.memory_space<vmem>>, vector<32x128xbf16>
    %cst = arith.constant dense<0.000000e+00> : vector<32x128xf32>
    %10 = tpu.matmul %8, %9, %cst {dimension_numbers = #tpu.dot_dimension_numbers<[1], [0], [0], [1], [0, 0, 1, 1], [], []>} : vector<32x32xbf16>, vector<32x128xbf16>, vector<32x128xf32> -> vector<32x128xf32>
    %c0_6 = arith.constant 0 : index
    %c0_7 = arith.constant 0 : index
    %11 = vector.load %arg4[%c0_6, %c0_7] : memref<1x128xf32, #tpu.memory_space<vmem>>, vector<1x128xf32>
    %12 = vector.broadcast %11 : vector<1x128xf32> to vector<32x128xf32>
    %13 = arith.addf %10, %12 : vector<32x128xf32>
    %cst_8 = arith.constant 0.000000e+00 : f32
    %14 = vector.broadcast %cst_8 : f32 to vector<32x128xf32>
    %15 = arith.maximumf %13, %14 : vector<32x128xf32>
    %16 = vector.shape_cast %15 : vector<32x128xf32> to vector<2x16x128xf32>
    %17 = vector.broadcast %6 : vector<2x16x1xf32> to vector<2x16x128xf32>
    %18 = arith.mulf %16, %17 : vector<2x16x128xf32>
    %cst_9 = arith.constant 0.000000e+00 : f32
    %19 = vector.broadcast %cst_9 : f32 to vector<2x1x128xf32>
    %c0_10 = arith.constant 0 : index
    %c0_11 = arith.constant 0 : index
    %c0_12 = arith.constant 0 : index
    %20 = vector.load %arg12[%c0_10, %c0_11, %c0_12] : memref<2x18x128xf32, #tpu.memory_space<vmem>>, vector<2x1x128xf32>
    tpu.vector_store %arg12[%c0_10, %c0_11, %c0_12], %19 {strides = array<i32>} : memref<2x18x128xf32, #tpu.memory_space<vmem>>, vector<2x1x128xf32>,
    %cst_13 = arith.constant 0.000000e+00 : f32
    %21 = vector.broadcast %cst_13 : f32 to vector<2x1x128xf32>
    %c0_14 = arith.constant 0 : index
    %c17 = arith.constant 17 : index
    %c0_15 = arith.constant 0 : index
    %22 = vector.load %arg12[%c0_14, %c17, %c0_15] : memref<2x18x128xf32, #tpu.memory_space<vmem>>, vector<2x1x128xf32>
    tpu.vector_store %arg12[%c0_14, %c17, %c0_15], %21 {strides = array<i32>} : memref<2x18x128xf32, #tpu.memory_space<vmem>>, vector<2x1x128xf32>,
    %c0_16 = arith.constant 0 : index
    %c1 = arith.constant 1 : index
    %c0_17 = arith.constant 0 : index
    %23 = vector.load %arg12[%c0_16, %c1, %c0_17] : memref<2x18x128xf32, #tpu.memory_space<vmem>>, vector<2x16x128xf32>
    tpu.vector_store %arg12[%c0_16, %c1, %c0_17], %18 {strides = array<i32>} : memref<2x18x128xf32, #tpu.memory_space<vmem>>, vector<2x16x128xf32>,
    %c0_18 = arith.constant 0 : index
    %c0_19 = arith.constant 0 : index
    %c0_20 = arith.constant 0 : index
    %24 = vector.load %arg12[%c0_18, %c0_19, %c0_20] : memref<2x18x128xf32, #tpu.memory_space<vmem>>, vector<2x16x128xf32>
    %25 = vector.shape_cast %24 : vector<2x16x128xf32> to vector<32x128xf32>
    %26 = arith.truncf %25 : vector<32x128xf32> to vector<32x128xbf16>
    %c0_21 = arith.constant 0 : index
    %c0_22 = arith.constant 0 : index
    %c0_23 = arith.constant 0 : index
    %27 = vector.load %arg5[%c0_21, %c0_22, %c0_23] : memref<3x128x128xbf16, #tpu.memory_space<vmem>>, vector<1x128x128xbf16>
    %28 = vector.shape_cast %27 : vector<1x128x128xbf16> to vector<128x128xbf16>
    %cst_24 = arith.constant dense<0.000000e+00> : vector<32x128xf32>
    %29 = tpu.matmul %26, %28, %cst_24 {dimension_numbers = #tpu.dot_dimension_numbers<[1], [0], [0], [1], [0, 0, 1, 1], [], []>} : vector<32x128xbf16>, vector<128x128xbf16>, vector<32x128xf32> -> vector<32x128xf32>
    %c0_25 = arith.constant 0 : index
    %c1_26 = arith.constant 1 : index
    %c0_27 = arith.constant 0 : index
    %30 = vector.load %arg12[%c0_25, %c1_26, %c0_27] : memref<2x18x128xf32, #tpu.memory_space<vmem>>, vector<2x16x128xf32>
    %31 = vector.shape_cast %30 : vector<2x16x128xf32> to vector<32x128xf32>
    %32 = arith.truncf %31 : vector<32x128xf32> to vector<32x128xbf16>
    %c1_28 = arith.constant 1 : index
    %c0_29 = arith.constant 0 : index
    %c0_30 = arith.constant 0 : index
    %33 = vector.load %arg5[%c1_28, %c0_29, %c0_30] : memref<3x128x128xbf16, #tpu.memory_space<vmem>>, vector<1x128x128xbf16>
    %34 = vector.shape_cast %33 : vector<1x128x128xbf16> to vector<128x128xbf16>
    %cst_31 = arith.constant dense<0.000000e+00> : vector<32x128xf32>
    %35 = tpu.matmul %32, %34, %cst_31 {dimension_numbers = #tpu.dot_dimension_numbers<[1], [0], [0], [1], [0, 0, 1, 1], [], []>} : vector<32x128xbf16>, vector<128x128xbf16>, vector<32x128xf32> -> vector<32x128xf32>
    %36 = arith.addf %29, %35 : vector<32x128xf32>
    %c0_32 = arith.constant 0 : index
    %c2 = arith.constant 2 : index
    %c0_33 = arith.constant 0 : index
    %37 = vector.load %arg12[%c0_32, %c2, %c0_33] : memref<2x18x128xf32, #tpu.memory_space<vmem>>, vector<2x16x128xf32>
    %38 = vector.shape_cast %37 : vector<2x16x128xf32> to vector<32x128xf32>
    %39 = arith.truncf %38 : vector<32x128xf32> to vector<32x128xbf16>
    %c2_34 = arith.constant 2 : index
    %c0_35 = arith.constant 0 : index
    %c0_36 = arith.constant 0 : index
    %40 = vector.load %arg5[%c2_34, %c0_35, %c0_36] : memref<3x128x128xbf16, #tpu.memory_space<vmem>>, vector<1x128x128xbf16>
    %41 = vector.shape_cast %40 : vector<1x128x128xbf16> to vector<128x128xbf16>
    %cst_37 = arith.constant dense<0.000000e+00> : vector<32x128xf32>
    %42 = tpu.matmul %39, %41, %cst_37 {dimension_numbers = #tpu.dot_dimension_numbers<[1], [0], [0], [1], [0, 0, 1, 1], [], []>} : vector<32x128xbf16>, vector<128x128xbf16>, vector<32x128xf32> -> vector<32x128xf32>
    %43 = arith.addf %36, %42 : vector<32x128xf32>
    %c0_38 = arith.constant 0 : index
    %c0_39 = arith.constant 0 : index
    %44 = vector.load %arg6[%c0_38, %c0_39] : memref<1x128xf32, #tpu.memory_space<vmem>>, vector<1x128xf32>
    %45 = vector.broadcast %44 : vector<1x128xf32> to vector<32x128xf32>
    %46 = arith.addf %43, %45 : vector<32x128xf32>
    %cst_40 = arith.constant 0.000000e+00 : f32
    %47 = vector.broadcast %cst_40 : f32 to vector<32x128xf32>
    %48 = arith.maximumf %46, %47 : vector<32x128xf32>
    %49 = vector.shape_cast %48 : vector<32x128xf32> to vector<2x16x128xf32>
    %50 = vector.broadcast %6 : vector<2x16x1xf32> to vector<2x16x128xf32>
    %51 = arith.mulf %49, %50 : vector<2x16x128xf32>
    %cst_41 = arith.constant dense<0xFF800000> : vector<2x128xf32>
    %52 = vector.multi_reduction <maximumf>, %51, %cst_41 [1] : vector<2x16x128xf32> to vector<2x128xf32>
    %53 = arith.truncf %52 : vector<2x128xf32> to vector<2x128xbf16>
    %c0_42 = arith.constant 0 : index
    %c0_43 = arith.constant 0 : index
    %54 = vector.load %arg7[%c0_42, %c0_43] : memref<128x128xbf16, #tpu.memory_space<vmem>>, vector<128x128xbf16>
    %cst_44 = arith.constant dense<0.000000e+00> : vector<2x128xf32>
    %55 = tpu.matmul %53, %54, %cst_44 {dimension_numbers = #tpu.dot_dimension_numbers<[1], [0], [0], [1], [0, 0, 1, 1], [], []>} : vector<2x128xbf16>, vector<128x128xbf16>, vector<2x128xf32> -> vector<2x128xf32>
    %c0_45 = arith.constant 0 : index
    %c0_46 = arith.constant 0 : index
    %56 = vector.load %arg8[%c0_45, %c0_46] : memref<1x128xf32, #tpu.memory_space<vmem>>, vector<1x128xf32>
    %57 = vector.broadcast %56 : vector<1x128xf32> to vector<2x128xf32>
    %58 = arith.addf %55, %57 : vector<2x128xf32>
    %cst_47 = arith.constant 0.000000e+00 : f32
    %59 = vector.broadcast %cst_47 : f32 to vector<2x128xf32>
    %60 = arith.maximumf %58, %59 : vector<2x128xf32>
    %61 = arith.truncf %60 : vector<2x128xf32> to vector<2x128xbf16>
    %c0_48 = arith.constant 0 : index
    %c0_49 = arith.constant 0 : index
    %62 = vector.load %arg9[%c0_48, %c0_49] : memref<128x256xbf16, #tpu.memory_space<vmem>>, vector<128x256xbf16>
    %cst_50 = arith.constant dense<0.000000e+00> : vector<2x256xf32>
    %63 = tpu.matmul %61, %62, %cst_50 {dimension_numbers = #tpu.dot_dimension_numbers<[1], [0], [0], [1], [0, 0, 1, 1], [], []>} : vector<2x128xbf16>, vector<128x256xbf16>, vector<2x256xf32> -> vector<2x256xf32>
    %c0_51 = arith.constant 0 : index
    %c0_52 = arith.constant 0 : index
    %64 = vector.load %arg10[%c0_51, %c0_52] : memref<1x256xf32, #tpu.memory_space<vmem>>, vector<1x256xf32>
    %65 = vector.broadcast %64 : vector<1x256xf32> to vector<2x256xf32>
    %66 = arith.addf %63, %65 : vector<2x256xf32>
    %c0_53 = arith.constant 0 : index
    %c0_54 = arith.constant 0 : index
    %67 = vector.load %arg11[%c0_53, %c0_54] : memref<2x256xf32, #tpu.memory_space<vmem>>, vector<2x256xf32>
    tpu.vector_store %arg11[%c0_53, %c0_54], %66 {strides = array<i32>} : memref<2x256xf32, #tpu.memory_space<vmem>>, vector<2x256xf32>,
    return
  }
  func.func @transform_0(%arg0: i32) -> (i32, i32) {
    %c0_i32 = arith.constant 0 : i32
    %c0_i32_0 = arith.constant 0 : i32
    return %arg0, %c0_i32 : i32, i32
  }
  func.func @transform_1(%arg0: i32) -> (i32, i32, i32) {
    %c0_i32 = arith.constant 0 : i32
    %c0_i32_0 = arith.constant 0 : i32
    %c0_i32_1 = arith.constant 0 : i32
    return %arg0, %c0_i32, %c0_i32_0 : i32, i32, i32
  }
  func.func @transform_2(%arg0: i32) -> (i32, i32) {
    %c0_i32 = arith.constant 0 : i32
    %c0_i32_0 = arith.constant 0 : i32
    %c0_i32_1 = arith.constant 0 : i32
    return %c0_i32, %c0_i32_0 : i32, i32
  }
  func.func @transform_3(%arg0: i32) -> (i32, i32) {
    %c0_i32 = arith.constant 0 : i32
    %c0_i32_0 = arith.constant 0 : i32
    %c0_i32_1 = arith.constant 0 : i32
    return %c0_i32, %c0_i32_0 : i32, i32
  }
  func.func @transform_4(%arg0: i32) -> (i32, i32, i32) {
    %c0_i32 = arith.constant 0 : i32
    %c0_i32_0 = arith.constant 0 : i32
    %c0_i32_1 = arith.constant 0 : i32
    %c0_i32_2 = arith.constant 0 : i32
    return %c0_i32, %c0_i32_0, %c0_i32_1 : i32, i32, i32
  }
  func.func @transform_5(%arg0: i32) -> (i32, i32) {
    %c0_i32 = arith.constant 0 : i32
    %c0_i32_0 = arith.constant 0 : i32
    %c0_i32_1 = arith.constant 0 : i32
    return %c0_i32, %c0_i32_0 : i32, i32
  }
  func.func @transform_6(%arg0: i32) -> (i32, i32) {
    %c0_i32 = arith.constant 0 : i32
    %c0_i32_0 = arith.constant 0 : i32
    %c0_i32_1 = arith.constant 0 : i32
    return %c0_i32, %c0_i32_0 : i32, i32
  }
  func.func @transform_7(%arg0: i32) -> (i32, i32) {
    %c0_i32 = arith.constant 0 : i32
    %c0_i32_0 = arith.constant 0 : i32
    %c0_i32_1 = arith.constant 0 : i32
    return %c0_i32, %c0_i32_0 : i32, i32
  }
  func.func @transform_8(%arg0: i32) -> (i32, i32) {
    %c0_i32 = arith.constant 0 : i32
    %c0_i32_0 = arith.constant 0 : i32
    %c0_i32_1 = arith.constant 0 : i32
    return %c0_i32, %c0_i32_0 : i32, i32
  }
  func.func @transform_9(%arg0: i32) -> (i32, i32) {
    %c0_i32 = arith.constant 0 : i32
    %c0_i32_0 = arith.constant 0 : i32
    %c0_i32_1 = arith.constant 0 : i32
    return %c0_i32, %c0_i32_0 : i32, i32
  }
  func.func @transform_10(%arg0: i32) -> (i32, i32) {
    %c0_i32 = arith.constant 0 : i32
    %c0_i32_0 = arith.constant 0 : i32
    return %arg0, %c0_i32 : i32, i32
  }
}

</mosaic_0001>

<bundles_post_ra>
// kernel: tpu_custom_call.1
= control target key start
LH: loop header
LB: loop body
LE: loop exit
PB: predicated region body
PF: predicated region fallthrough
CT: control target
= control target key end

     0   :  { %15 = vsyncpa [#allocation3], 0  ;;  %s1371_s0 = inlined_call_operand.vmem [shape: s32[2,1], index: 0, kind: input, shape index: {}]   ;;  %s1372_s1 = inlined_call_operand.hbm [shape: bf16[2,16,32], index: 1, kind: input, shape index: {}]   ;;  %s1373_s2 = inlined_call_operand.hbm [shape: bf16[32,128], index: 2, kind: input, shape index: {}]   ;;  %s1374_s3 = inlined_call_operand.vmem [shape: f32[1,128], index: 3, kind: input, shape index: {}]   ;;  %s1375_s4 = inlined_call_operand.hbm [shape: bf16[3,128,128], index: 4, kind: input, shape index: {}]   ;;  %s1376_s5 = inlined_call_operand.vmem [shape: f32[1,128], index: 5, kind: input, shape index: {}]   ;;  %s1377_s6 = inlined_call_operand.hbm [shape: bf16[128,128], index: 6, kind: input, shape index: {}]   ;;  %s1378_s7 = inlined_call_operand.vmem [shape: f32[1,128], index: 7, kind: input, shape index: {}]   ;;  %s1379_s8 = inlined_call_operand.hbm [shape: bf16[128,256], index: 8, kind: input, shape index: {}]   ;;  %s1380_s9 = inlined_call_operand.vmem [shape: f32[1,256], index: 9, kind: input, shape index: {}]   ;;  %s1381_s10 = inlined_call_operand.hbm [shape: f32[2,256], index: 10, kind: output, shape index: {}]  }
   0x1   :  { %16 = vsyncpa [#allocation6], 0 }
   0x2   :  { %17 = vsyncpa [#allocation9], 0 }
   0x3   :  { %18 = vsyncpa [#allocation4], 0  ;;  %s38_s15 = sshll.u32 %s1373_s2, 4  ;;  %s1222_s16 = smov [#allocation5]   ;;  %s39_s15 = int_to_ptr.hbm [resolvable:$true] %s38_s15 }
   0x4   :  { %s40_s17 = sshll.u32 %s1222_s16, 4  ;;  %s68_s20 = sshll.u32 %s1377_s6, 4  ;;  %s41_s17 = int_to_ptr.vmem [resolvable:$true] %s40_s17  ;;  %s69_s20 = int_to_ptr.hbm [resolvable:$true] %s68_s20 }
   0x5   :  { %s1223_s21 = smov 64   ;;  %s1224_s22 = smov 4  }
   0x6   :  { %46 = dma.hbm_to_vmem [thread:$0]  %s39_s15, 256, %s41_s17, [#allocation6], %s1223_s21, %s1223_s21, %s1224_s22  }
   0x7   :  { %s1225_s23 = smov [#allocation8]   ;;  %s25_s27 = sshll.u32 %s1372_s1, 4  ;;  %s26_s27 = int_to_ptr.hbm [resolvable:$true] %s25_s27 }
   0x8   :  { %s70_s24 = sshll.u32 %s1225_s23, 4  ;;  %s53_s29 = sshll.u32 %s1375_s4, 4  ;;  %s71_s24 = int_to_ptr.vmem [resolvable:$true] %s70_s24  ;;  %s54_s29 = int_to_ptr.hbm [resolvable:$true] %s53_s29 }
   0x9   :  { %76 = dma.hbm_to_vmem [thread:$0]  %s69_s20, 1024, %s71_s24, [#allocation9], %s1223_s21, %s1223_s21, %s1224_s22  }
   0xa   :  { %s1226_s30 = smov [#allocation2]   ;;  %s1227_s6 = smov [#allocation7]  }
   0xb   :  { %s27_s11 = sshll.u32 %s1226_s30, 4  ;;  %s55_s12 = sshll.u32 %s1227_s6, 4  ;;  %s28_s11 = int_to_ptr.vmem [resolvable:$true] %s27_s11  ;;  %s56_s12 = int_to_ptr.vmem [resolvable:$true] %s55_s12 }
   0xc   :  { %33 = dma.hbm_to_vmem [thread:$0]  %s26_s27, 256, %s28_s11, [#allocation3], %s1223_s21, %s1223_s21, %s1224_s22  }
   0xd   :  { %s83_s15 = sshll.u32 %s1379_s8, 4  ;;  %s1228_s1 = smov [#allocation10]   ;;  %s84_s15 = int_to_ptr.hbm [resolvable:$true] %s83_s15 }
   0xe   :  { %61 = dma.hbm_to_vmem [thread:$0]  %s54_s29, 3072, %s56_s12, [#allocation6], %s1223_s21, %s1223_s21, %s1224_s22  }
   0xf   :  { %s85_s16 = sshll.u32 %s1228_s1, 4  ;;  %s1229_s17 = smov 128   ;;  %s86_s16 = int_to_ptr.vmem [resolvable:$true] %s85_s16 }
  0x10   :  { %s1230_s18 = smov 8  }
  0x11   :  { %91 = dma.hbm_to_vmem [thread:$0]  %s84_s15, 2048, %s86_s16, [#allocation9], %s1229_s17, %s1229_s17, %s1230_s18  }
  0x12   :  { %1214 = dma.done.wait [#allocation3], 256  }
  0x13   :  { %1215 = vsyncadd [#allocation3], 4294967040 }
  0x14   :  { %1216 = dma.done.wait [#allocation6], 3328  }
  0x15   :  { %1217 = vsyncadd [#allocation6], 4294963968 }
  0x16   :  { %1218 = dma.done.wait [#allocation9], 3072  }
  0x17   :  { %1219 = vsyncadd [#allocation9], 4294964224  ;;  %v117_v0 = vlaneseq  ;;  %v1231_v1 = vmov 0   ;;  %v995_v3 = vld [vmem:[#allocation5 + $0x8] sm:$0xff]  ;;  %v115_v5 = vld [vmem:[%s1371_s0] sm:$0x3] }
  0x18   :  { %1056 = vset.pattern.permute.xlu0 %v1231_v1  ;;  %v1003_v6 = vld [vmem:[#allocation7 + $0x38] sm:$0xff]  ;;  %181 = vmatpush.bf16.msra.mxu0 %v995_v3  ;;  %v994_v7 = vld [vmem:[#allocation5] sm:$0xff]  ;;  %v120_v8 = vperm.slane %v115_v5, 0  ;;  %v116_v9 = vrot.slane %v115_v5, 1  ;;  %v992_v15 = vld [vmem:[#allocation2] sm:$0xff]  ;;  %v1232_v16 = vmov 0.0  }
  0x19   :  { %v1304_v2 = vshrl.u32 %v117_v0, 7  ;;  %v1011_v10 = vld [vmem:[#allocation7 + $0x78] sm:$0xff]  ;;  %288 = vmatpush.bf16.msra.mxu1 %v1003_v6  ;;  %v1002_v12 = vld [vmem:[#allocation7 + $0x30] sm:$0xff]  ;;  %vm168_vm2 = vcmask 261120   ;;  %v1001_v21 = vld [vmem:[#allocation7 + $0x28] sm:$0xff]  ;;  %vm557_vm7 = vcmask 1041409  }
  0x1a   :  { %v1019_v11 = vld [vmem:[#allocation7 + $0xb8] sm:$0xff]  ;;  %v121_v13 = vperm.slane %v116_v9, 0  ;;  %381 = vmatpush.bf16.msra.mxu2 %v1011_v10  ;;  %v1010_v14 = vld [vmem:[#allocation7 + $0x70] sm:$0xff]  ;;  %v1009_v22 = vld [vmem:[#allocation7 + $0x68] sm:$0xff]  ;;  %s1233_s24 = smov [#allocation11]   ;;  %s766_s27 = sshll.u32 %s1381_s10, 4  ;;  %s767_s27 = int_to_ptr.hbm [resolvable:$true] %s766_s27 }
  0x1b   :  { %v119_v4 = vadd.s32 8, %v1304_v2  ;;  %vm122_vm0 = vcmp.lt.s32.totalorder %v1304_v2, %v120_v8  ;;  %469 = vmatpush.bf16.msra.mxu3 %v1019_v11  ;;  %v1018_v19 = vld [vmem:[#allocation7 + $0xb0] sm:$0xff]  ;;  %v1017_v25 = vld [vmem:[#allocation7 + $0xa8] sm:$0xff]  ;;  %v1000_v26 = vld [vmem:[#allocation7 + $0x20] sm:$0xff]  ;;  %vm311_vm5 = vcmp.lt.s32.totalorder %v1304_v2, 1  ;;  %vm492_vm6 = vcmp.lt.s32.totalorder %v1304_v2, 7 }
  0x1c   :  { %v778_v17 = vsel %vm122_vm0, 1.0, %v1232_v16  ;;  %182 = vmatpush.bf16.msra.mxu0 %v994_v7  ;;  %vm124_vm3 = vcmp.lt.s32.totalorder %v1304_v2, %v121_v13  ;;  %v1008_v28 = vld [vmem:[#allocation7 + $0x60] sm:$0xff]  ;;  %v993_v30 = vld [vmem:[#allocation2 + $0x8] sm:$0xff]  ;;  %v999_v31 = vld [vmem:[#allocation7 + $0x18] sm:$0xff]  ;;  %s764_s25 = sshll.u32 %s1233_s24, 4  ;;  %vm755_vm8 = vcmask 1041408   ;;  %s765_s25 = int_to_ptr.vmem [resolvable:$true] %s764_s25 }
  0x1d   :  { %vm123_vm1 = vcmp.lt.s32.totalorder %v119_v4, %v120_v8  ;;  %vm125_vm4 = vcmp.lt.s32.totalorder %v119_v4, %v121_v13  ;;  %289 = vmatpush.bf16.msra.mxu1 %v1002_v12  ;;  %v780_v23 = vsel %vm124_vm3, 1.0, %v1232_v16  ;;  %v1016_v29 = vld [vmem:[#allocation7 + $0xa0] sm:$0xff]  ;;  %v1007_v32 = vld [vmem:[#allocation7 + $0x58] sm:$0xff]  ;;  %v998_v34 = vld [vmem:[#allocation7 + $0x10] sm:$0xff] }
  0x1e   :  { %v779_v18 = vsel %vm123_vm1, 1.0, %v1232_v16  ;;  %382 = vmatpush.bf16.msra.mxu2 %v1010_v14  ;;  %v781_v24 = vsel %vm125_vm4, 1.0, %v1232_v16  ;;  %v1015_v33 = vld [vmem:[#allocation7 + $0x98] sm:$0xff]  ;;  %v1006_v35 = vld [vmem:[#allocation7 + $0x50] sm:$0xff]  ;;  %v997_v37 = vld [vmem:[#allocation7 + $0x8] sm:$0xff] }
  0x1f   :  { %v1057_v20 = vpack.i.bf16 %v779_v18, %v778_v17  ;;  %798 = vmatmul.msk.bf16.vlgmr.msra.gmra.mxu0 %vm168_vm2, %v992_v15  ;;  %470 = vmatpush.bf16.msra.mxu3 %v1018_v19  ;;  %v1062_v27 = vpack.i.bf16 %v781_v24, %v780_v23  ;;  %v1014_v36 = vld [vmem:[#allocation7 + $0x90] sm:$0xff]  ;;  %v1005_v38 = vld [vmem:[#allocation7 + $0x48] sm:$0xff]  ;;  %v996_v40 = vld [vmem:[#allocation7] sm:$0xff] }
  0x20   :  { %v1013_v39 = vld [vmem:[#allocation7 + $0x88] sm:$0xff]  ;;  %v1004_v41 = vld [vmem:[#allocation7 + $0x40] sm:$0xff]  ;;  %v1027_v5 = vld [vmem:[#allocation8 + $0x38] sm:$0xff] }
  0x21   :  { %1058 = vperm.xlu0 %1056, %v1057_v20   ;;  %290 = vmatpush.bf16.msra.mxu1 %v1001_v21  ;;  %v1012_v42 = vld [vmem:[#allocation7 + $0x80] sm:$0xff]  ;;  %v1026_v7 = vld [vmem:[#allocation8 + $0x30] sm:$0xff]  ;;  %v1025_v10 = vld [vmem:[#allocation8 + $0x28] sm:$0xff] }
  0x22   :  { %383 = vmatpush.bf16.msra.mxu2 %v1009_v22  ;;  %v1067_v44 = vld [vmem:[%s1374_s3] ss:$0 sm:$0xff]  ;;  %609 = vmatpush.bf16.msrb.mxu0 %v1027_v5  ;;  %v1023_v13 = vld [vmem:[#allocation8 + $0x18] sm:$0xff]  ;;  %v1022_v17 = vld [vmem:[#allocation8 + $0x10] sm:$0xff] }
  0x23   :  { %471 = vmatpush.bf16.msra.mxu3 %v1017_v25  ;;  %v1024_v12 = vld [vmem:[#allocation8 + $0x20] sm:$0xff]  ;;  %v1021_v19 = vld [vmem:[#allocation8 + $0x8] sm:$0xff] }
  0x25   :  { %291 = vmatpush.bf16.msra.mxu1 %v1000_v26 }
  0x26   :  { %384 = vmatpush.bf16.msra.mxu2 %v1008_v28  ;;  %610 = vmatpush.bf16.msrb.mxu0 %v1026_v7  ;;  %v1068_v28 = vld [vmem:[%s1376_s5] ss:$0 sm:$0xff]  ;;  %v1041_v7 = vld [vmem:[#allocation10 + $0x64] sm:$0xf0] }
  0x27   :  { %472 = vmatpush.bf16.msra.mxu3 %v1016_v29 }
  0x29   :  { %1063 = vperm.xlu0 %1056, %v1062_v27   ;;  %292 = vmatpush.bf16.msra.mxu1 %v999_v31 }
  0x2a   :  { %385 = vmatpush.bf16.msra.mxu2 %v1007_v32  ;;  %611 = vmatpush.bf16.msrb.mxu0 %v1025_v10 }
  0x2b   :  { %473 = vmatpush.bf16.msra.mxu3 %v1015_v33 }
  0x2d   :  { %293 = vmatpush.bf16.msra.mxu1 %v998_v34 }
  0x2e   :  { %386 = vmatpush.bf16.msra.mxu2 %v1006_v35  ;;  %612 = vmatpush.bf16.msrb.mxu0 %v1024_v12  ;;  %v972_v12 = vld [vmem:[#allocation10 + $0x58] sm:$0xf0] }
  0x2f   :  { %799 = vmatmul.msk.bf16.gmra.mxu0 %vm168_vm2, %v993_v30  ;;  %474 = vmatpush.bf16.msra.mxu3 %v1014_v36  ;;  %v1020_v30 = vld [vmem:[#allocation8] sm:$0xff] }
  0x31   :  { %294 = vmatpush.bf16.msra.mxu1 %v997_v37 }
  0x32   :  { %387 = vmatpush.bf16.msra.mxu2 %v1005_v38  ;;  %613 = vmatpush.bf16.msrb.mxu0 %v1023_v13 }
  0x33   :  { %475 = vmatpush.bf16.msra.mxu3 %v1013_v39 }
  0x35   :  { %295 = vmatpush.bf16.msra.mxu1 %v996_v40 }
  0x36   :  { %388 = vmatpush.bf16.msra.mxu2 %v1004_v41  ;;  %614 = vmatpush.bf16.msrb.mxu0 %v1022_v17 }
  0x37   :  { %476 = vmatpush.bf16.msra.mxu3 %v1012_v42 }
  0x3a   :  { %615 = vmatpush.bf16.msrb.mxu0 %v1021_v19 }
  0x3e   :  { %616 = vmatpush.bf16.msrb.mxu0 %v1020_v30  ;;  %v1034_v30 = vld [vmem:[#allocation10 + $0x34] sm:$0xf] }
  0x93   :  { %v1317_v46 = vpop.permute.xlu0 %1058 }
  0x94   :  { %v1061_v49 = vunpack.i.h.bf16 %v1317_v46  ;;  %v1060_v50 = vunpack.i.l.bf16 %v1317_v46 }
  0x9b   :  { %v1325_v58 = vpop.permute.xlu0 %1063 }
  0x9c   :  { %v184_v43 = vpop.f32.mrf.mxu0  ;;  %v1066_v62 = vunpack.i.h.bf16 %v1325_v58  ;;  %v1065_v63 = vunpack.i.l.bf16 %v1325_v58 }
  0x9d   :  { %v185_v45 = vadd.f32 %v1067_v44, %v184_v43 }
  0x9f   :  { %v194_v48 = vmax.f32 %v185_v45, 0.0 }
  0xa1   :  { %v218_v53 = vmul.f32 %v1060_v50, %v194_v48 }
  0xa4   :  { %v186_v47 = vpop.f32.mrf.mxu0 }
  0xa5   :  { %v187_v51 = vadd.f32 %v1067_v44, %v186_v47 }
  0xa7   :  { %v195_v52 = vmax.f32 %v187_v51, 0.0  ;;  %v1042_v51 = vld [vmem:[#allocation10 + $0x74] sm:$0xf] }
  0xa9   :  { %v219_v54 = vmul.f32 %v1061_v49, %v195_v52  ;;  %v988_v52 = vld [vmem:[#allocation10 + $0x78] sm:$0xf0] }
  0xab   :  { %v222_v55 = vpack.c.bf16 %v219_v54, %v218_v53  ;;  %v991_v54 = vor.u32 %v1042_v51, %v988_v52 }
  0xac   :  { %v189_v56 = vpop.f32.mrf.mxu0 }
  0xad   :  { %296 = vmatmul.bf16.vlgmr.msra.gmra.mxu1 %v222_v55  ;;  %389 = vmatmul.bf16.vlgmr.msra.gmra.mxu2 %v222_v55  ;;  %v190_v57 = vadd.f32 %v1067_v44, %v189_v56  ;;  %v1043_v56 = vld [vmem:[#allocation10 + $0x74] sm:$0xf0] }
  0xae   :  { %477 = vmatmul.bf16.vlgmr.msra.gmra.mxu3 %v222_v55  ;;  %v986_v55 = vld [vmem:[#allocation10 + $0x70] sm:$0xf]  ;;  %739 = vmatpush.bf16.msrb.mxu2 %v991_v54 }
  0xaf   :  { %v196_v60 = vmax.f32 %v190_v57, 0.0  ;;  %v1040_v57 = vld [vmem:[#allocation10 + $0x64] sm:$0xf] }
  0xb1   :  { %v220_v1 = vmul.f32 %v1065_v63, %v196_v60 }
  0xb4   :  { %v191_v59 = vpop.f32.mrf.mxu0 }
  0xb5   :  { %v192_v61 = vadd.f32 %v1067_v44, %v191_v59 }
  0xb7   :  { %v197_v0 = vmax.f32 %v192_v61, 0.0 }
  0xb9   :  { %v221_v3 = vmul.f32 %v1066_v62, %v197_v0  ;;  %v987_v0 = vor.u32 %v1043_v56, %v986_v55 }
  0xbb   :  { %v223_v4 = vpack.c.bf16 %v221_v3, %v220_v1  ;;  %v980_v1 = vld [vmem:[#allocation10 + $0x68] sm:$0xf0]  ;;  %v978_v3 = vld [vmem:[#allocation10 + $0x60] sm:$0xf]  ;;  %726 = vmatpush.bf16.msrb.mxu1 %v987_v0  ;;  %v1031_v0 = vld [vmem:[#allocation10 + $0x14] sm:$0xf0] }
  0xbc   :  { %v979_v10 = vor.u32 %v1041_v7, %v978_v3  ;;  %v1028_v3 = vld [vmem:[#allocation10 + $0x4] sm:$0xf]  ;;  %v1029_v7 = vld [vmem:[#allocation10 + $0x4] sm:$0xf0] }
  0xbd   :  { %301 = vmatmul.bf16.gmra.mxu1 %v223_v4  ;;  %394 = vmatmul.bf16.gmra.mxu2 %v223_v4 }
  0xbe   :  { %482 = vmatmul.bf16.gmra.mxu3 %v223_v4 }
  0xbf   :  { %727 = vmatpush.bf16.msrb.mxu1 %v979_v10 }
 0x12a   :  { %v297_v6 = vpop.f32.mrf.mxu1 }
 0x12b   :  { %v307_v20 = vrot.slane %v297_v6, 7  ;;  %v983_v6 = vor.u32 %v1040_v57, %v980_v1 }
 0x12d   :  { %740 = vmatpush.bf16.msrb.mxu2 %v983_v6 }
 0x130   :  { %v390_v8 = vpop.f32.mrf.mxu2 }
 0x131   :  { %v478_v9 = vpop.f32.mrf.mxu3 }
 0x132   :  { %v299_v11 = vpop.f32.mrf.mxu1  ;;  %v488_v32 = vrot.slane %v478_v9, 1 }
 0x133   :  { %v308_v18 = vrot.slane %v299_v11, 7  ;;  %v1038_v11 = vld [vmem:[#allocation10 + $0x54] sm:$0xf] }
 0x134   :  { %v975_v19 = vor.u32 %v1038_v11, %v972_v12 }
 0x135   :  { %v314_v23 = vsel %vm311_vm5, %v307_v20, %v308_v18 }
 0x136   :  { %741 = vmatpush.bf16.msrb.mxu2 %v975_v19 }
 0x138   :  { %v392_v14 = vpop.f32.mrf.mxu2 }
 0x139   :  { %v480_v15 = vpop.f32.mrf.mxu3  ;;  %v401_v27 = vadd.f32 %v392_v14, %v314_v23  ;;  %v970_v14 = vld [vmem:[#allocation10 + $0x50] sm:$0xf]  ;;  %v962_v23 = vld [vmem:[#allocation10 + $0x40] sm:$0xf] }
 0x13a   :  { %v302_v16 = vpop.f32.mrf.mxu1  ;;  %v489_v24 = vrot.slane %v480_v15, 1  ;;  %v1039_v15 = vld [vmem:[#allocation10 + $0x54] sm:$0xf0] }
 0x13b   :  { %v309_v35 = vrot.slane %v302_v16, 7 }
 0x13c   :  { %v495_v37 = vsel %vm492_vm6, %v488_v32, %v489_v24 }
 0x13d   :  { %v313_v44 = vsel %vm311_vm5, %v308_v18, %v309_v35 }
 0x140   :  { %v395_v21 = vpop.f32.mrf.mxu2 }
 0x141   :  { %v483_v22 = vpop.f32.mrf.mxu3  ;;  %v402_v53 = vadd.f32 %v395_v21, %v313_v44  ;;  %v971_v21 = vor.u32 %v1039_v15, %v970_v14  ;;  %v640_v15 = vld [vmem:[%s1380_s9] sm:$0x3] }
 0x142   :  { %v490_v25 = vrot.slane %v483_v22, 1  ;;  %v304_v26 = vpop.f32.mrf.mxu1  ;;  %v964_v22 = vld [vmem:[#allocation10 + $0x48] sm:$0xf0] }
 0x143   :  { %v310_v29 = vrot.slane %v304_v26, 7  ;;  %728 = vmatpush.bf16.msrb.mxu1 %v971_v21 }
 0x144   :  { %v494_v31 = vsel %vm492_vm6, %v489_v24, %v490_v25  ;;  %v1037_v24 = vld [vmem:[#allocation10 + $0x44] sm:$0xf0] }
 0x145   :  { %v498_v33 = vadd.f32 %v494_v31, %v401_v27  ;;  %v315_v34 = vsel %vm311_vm5, %v310_v29, %v307_v20  ;;  %v312_v40 = vsel %vm311_vm5, %v309_v35, %v310_v29  ;;  %v963_v29 = vor.u32 %v1037_v24, %v962_v23  ;;  %v956_v31 = vld [vmem:[#allocation10 + $0x38] sm:$0xf0] }
 0x146   :  { %v400_v36 = vadd.f32 %v390_v8, %v315_v34  ;;  %v1035_v34 = vld [vmem:[#allocation10 + $0x34] sm:$0xf0] }
 0x147   :  { %v506_v38 = vadd.f32 %v1068_v28, %v498_v33  ;;  %v954_v33 = vld [vmem:[#allocation10 + $0x30] sm:$0xf]  ;;  %729 = vmatpush.bf16.msrb.mxu1 %v963_v29 }
 0x148   :  { %v497_v39 = vadd.f32 %v495_v37, %v400_v36  ;;  %v397_v41 = vpop.f32.mrf.mxu2  ;;  %v1032_v37 = vld [vmem:[#allocation10 + $0x24] sm:$0xf] }
 0x149   :  { %v403_v42 = vadd.f32 %v397_v41, %v312_v40  ;;  %v485_v43 = vpop.f32.mrf.mxu3  ;;  %v510_v45 = vmax.f32 %v506_v38, 0.0  ;;  %v948_v38 = vld [vmem:[#allocation10 + $0x28] sm:$0xf0]  ;;  %v946_v40 = vld [vmem:[#allocation10 + $0x20] sm:$0xf] }
 0x14a   :  { %v505_v47 = vadd.f32 %v1068_v28, %v497_v39  ;;  %v491_v48 = vrot.slane %v485_v43, 1  ;;  %v1033_v41 = vld [vmem:[#allocation10 + $0x24] sm:$0xf0]  ;;  %v951_v44 = vor.u32 %v1032_v37, %v948_v38 }
 0x14b   :  { %v514_v8 = vmul.f32 %v1061_v49, %v510_v45  ;;  %v1036_v49 = vld [vmem:[#allocation10 + $0x44] sm:$0xf]  ;;  %v947_v45 = vor.u32 %v1033_v41, %v946_v40 }
 0x14c   :  { %v509_v59 = vmax.f32 %v505_v47, 0.0  ;;  %v493_v60 = vsel %vm492_vm6, %v490_v25, %v491_v48  ;;  %v496_v61 = vsel %vm492_vm6, %v491_v48, %v488_v32  ;;  %v967_v27 = vor.u32 %v1036_v49, %v964_v22  ;;  %v1030_v47 = vld [vmem:[#allocation10 + $0x14] sm:$0xf]  ;;  %v940_v48 = vld [vmem:[#allocation10 + $0x18] sm:$0xf0] }
 0x14d   :  { %v499_v4 = vadd.f32 %v493_v60, %v402_v53  ;;  %v500_v5 = vadd.f32 %v496_v61, %v403_v42  ;;  %v943_v54 = vor.u32 %v1030_v47, %v940_v48  ;;  %v938_v61 = vld [vmem:[#allocation10 + $0x10] sm:$0xf] }
 0x14e   :  { %v513_v9 = vmul.f32 %v1060_v50, %v509_v59  ;;  %742 = vmatpush.bf16.msrb.mxu2 %v967_v27  ;;  %v939_v1 = vor.u32 %v1031_v0, %v938_v61 }
 0x14f   :  { %v507_v2 = vadd.f32 %v1068_v28, %v499_v4  ;;  %v508_v13 = vadd.f32 %v1068_v28, %v500_v5  ;;  %v932_v4 = vld [vmem:[#allocation10 + $0x8] sm:$0xf0]  ;;  %v930_v5 = vld [vmem:[#allocation10] sm:$0xf] }
 0x150   :  { %v517_v16 = vmax.f32 %v513_v9, %v514_v8  ;;  %v935_v6 = vor.u32 %v1028_v3, %v932_v4  ;;  %v931_v8 = vor.u32 %v1029_v7, %v930_v5  ;;  %v1069_v9 = vld [vmem:[%s1378_s7] ss:$0 sm:$0xff] }
 0x151   :  { %v511_v17 = vmax.f32 %v507_v2, 0.0  ;;  %v512_v18 = vmax.f32 %v508_v13, 0.0 }
 0x152   :  { %v518_v20 = vrot.slane %v517_v16, 4 }
 0x153   :  { %v515_v46 = vmul.f32 %v1065_v63, %v511_v17  ;;  %v516_v50 = vmul.f32 %v1066_v62, %v512_v18  ;;  %v959_v63 = vor.u32 %v1034_v30, %v956_v31  ;;  %v955_v62 = vor.u32 %v1035_v34, %v954_v33 }
 0x154   :  { %v519_v25 = vmax.f32 %v517_v16, %v518_v20  ;;  %v643_v16 = vperm.slane %v640_v15, 1  ;;  %v642_v17 = vperm.slane %v640_v15, 0 }
 0x155   :  { %v524_v26 = vmax.f32 %v515_v46, %v516_v50  ;;  %743 = vmatpush.bf16.msrb.mxu2 %v959_v63  ;;  %730 = vmatpush.bf16.msrb.mxu1 %v955_v62 }
 0x156   :  { %v520_v28 = vrot.slane %v519_v25, 2 }
 0x157   :  { %v525_v32 = vrot.slane %v524_v26, 4 }
 0x158   :  { %v521_v35 = vmax.f32 %v519_v25, %v520_v28 }
 0x159   :  { %v526_v36 = vmax.f32 %v524_v26, %v525_v32  ;;  %744 = vmatpush.bf16.msrb.mxu2 %v951_v44  ;;  %731 = vmatpush.bf16.msrb.mxu1 %v947_v45 }
 0x15a   :  { %v522_v58 = vrot.slane %v521_v35, 1 }
 0x15b   :  { %v527_v39 = vrot.slane %v526_v36, 2 }
 0x15c   :  { %v523_v42 = vmax.f32 %v521_v35, %v522_v58 }
 0x15d   :  { %v528_v43 = vmax.f32 %v526_v36, %v527_v39  ;;  %745 = vmatpush.bf16.msrb.mxu2 %v943_v54  ;;  %732 = vmatpush.bf16.msrb.mxu1 %v939_v1 }
 0x15e   :  { %v531_v53 = vpack.c.bf16 %v523_v42, %v523_v42 }
 0x15f   :  { %v529_v51 = vrot.slane %v528_v43, 1 }
 0x160   :  { %v555_v56 = vunpack.c.l.b16 %v531_v53 }
 0x161   :  { %v530_v52 = vmax.f32 %v528_v43, %v529_v51  ;;  %746 = vmatpush.bf16.msrb.mxu2 %v935_v6  ;;  %733 = vmatpush.bf16.msrb.mxu1 %v931_v8 }
 0x163   :  { %v532_v55 = vpack.c.bf16 %v530_v52, %v530_v52 }
 0x165   :  { %v556_v57 = vunpack.c.l.b16 %v532_v55 }
 0x167   :  { %v558_v59 = vsel %vm557_vm7, %v556_v57, %v555_v56 }
 0x168   :  { %v559_v60 = vpack.c.b16 %v558_v59, %v558_v59 }
 0x16a   :  { %617 = vmatmul.bf16.vlgmr.msrb.gmra.mxu0 %v559_v60 }
 0x1e7   :  { %v618_v10 = vpop.f32.mrf.mxu0 }
 0x1e8   :  { %v619_v11 = vadd.f32 %v1069_v9, %v618_v10 }
 0x1ea   :  { %v622_v12 = vmax.f32 %v619_v11, 0.0 }
 0x1ec   :  { %v623_v2 = vpack.c.bf16 %v622_v12, %v622_v12 }
 0x1ee   :  { %734 = vmatmul.bf16.vlgmr.msrb.gmra.mxu1 %v623_v2  ;;  %747 = vmatmul.bf16.vlgmr.msrb.gmra.mxu2 %v623_v2 }
 0x1ef   :  { %v620_v13 = vpop.f32.mrf.mxu0 }
 0x26b   :  { %v735_v14 = vpop.f32.mrf.mxu1 }
 0x26c   :  { %v736_v21 = vadd.f32 %v735_v14, %v642_v17 }
 0x271   :  { %v748_v18 = vpop.f32.mrf.mxu2 }
 0x272   :  { %v749_v19 = vadd.f32 %v748_v18, %v643_v16 }
 0x273   :  { %v737_v20 = vpop.f32.mrf.mxu1 }
 0x274   :  { %v754_v49 = vrot.slane %v749_v19, 6 }
 0x276   :  { %v756_v22 = vsel %vm755_vm8, %v736_v21, %v754_v49 }
 0x277   :  { %758 = vst [vmem:[#allocation11] sm:$0xf] %v756_v22 }
 0x278   :  { %769 = dma.vmem_to_hbm [thread:$0]  %s765_s25, 64, %s767_s27, [#allocation4]  }
 0x279   :  { %v750_v46 = vpop.f32.mrf.mxu2 }
 0x27a   :  { %1220 = dma.done.wait [#allocation4], 64  }
 0x27b   :  { %1221 = vsyncadd [#allocation4], 4294967232 }
 0x27c   :  { %774 = vsyncpa [#allocation3], 1 }
 0x27d   :  { %775 = vsyncpa [#allocation6], 1 }
 0x27e   :  { %776 = vsyncpa [#allocation9], 1 }
 0x27f   :  { %777 = vsyncpa [#allocation4], 1 }

// kernel: tpu_custom_call.1
= control target key start
LH: loop header
LB: loop body
LE: loop exit
PB: predicated region body
PF: predicated region fallthrough
CT: control target
= control target key end

     0   :  { %15 = vsyncpa [#allocation3], 0  ;;  %s1371_s0 = inlined_call_operand.vmem [shape: s32[2,1], index: 0, kind: input, shape index: {}]   ;;  %s1372_s1 = inlined_call_operand.hbm [shape: bf16[2,16,32], index: 1, kind: input, shape index: {}]   ;;  %s1373_s2 = inlined_call_operand.hbm [shape: bf16[32,128], index: 2, kind: input, shape index: {}]   ;;  %s1374_s3 = inlined_call_operand.vmem [shape: f32[1,128], index: 3, kind: input, shape index: {}]   ;;  %s1375_s4 = inlined_call_operand.hbm [shape: bf16[3,128,128], index: 4, kind: input, shape index: {}]   ;;  %s1376_s5 = inlined_call_operand.vmem [shape: f32[1,128], index: 5, kind: input, shape index: {}]   ;;  %s1377_s6 = inlined_call_operand.hbm [shape: bf16[128,128], index: 6, kind: input, shape index: {}]   ;;  %s1378_s7 = inlined_call_operand.vmem [shape: f32[1,128], index: 7, kind: input, shape index: {}]   ;;  %s1379_s8 = inlined_call_operand.hbm [shape: bf16[128,256], index: 8, kind: input, shape index: {}]   ;;  %s1380_s9 = inlined_call_operand.vmem [shape: f32[1,256], index: 9, kind: input, shape index: {}]   ;;  %s1381_s10 = inlined_call_operand.hbm [shape: f32[2,256], index: 10, kind: output, shape index: {}]  }
   0x1   :  { %16 = vsyncpa [#allocation6], 0 }
   0x2   :  { %17 = vsyncpa [#allocation9], 0 }
   0x3   :  { %18 = vsyncpa [#allocation4], 0  ;;  %s38_s15 = sshll.u32 %s1373_s2, 4  ;;  %s1222_s16 = smov [#allocation5]   ;;  %s39_s15 = int_to_ptr.hbm [resolvable:$true] %s38_s15 }
   0x4   :  { %s40_s17 = sshll.u32 %s1222_s16, 4  ;;  %s68_s20 = sshll.u32 %s1377_s6, 4  ;;  %s41_s17 = int_to_ptr.vmem [resolvable:$true] %s40_s17  ;;  %s69_s20 = int_to_ptr.hbm [resolvable:$true] %s68_s20 }
   0x5   :  { %s1223_s21 = smov 64   ;;  %s1224_s22 = smov 4  }
   0x6   :  { %46 = dma.hbm_to_vmem [thread:$0]  %s39_s15, 256, %s41_s17, [#allocation6], %s1223_s21, %s1223_s21, %s1224_s22  }
   0x7   :  { %s1225_s23 = smov [#allocation8]   ;;  %s25_s27 = sshll.u32 %s1372_s1, 4  ;;  %s26_s27 = int_to_ptr.hbm [resolvable:$true] %s25_s27 }
   0x8   :  { %s70_s24 = sshll.u32 %s1225_s23, 4  ;;  %s53_s29 = sshll.u32 %s1375_s4, 4  ;;  %s71_s24 = int_to_ptr.vmem [resolvable:$true] %s70_s24  ;;  %s54_s29 = int_to_ptr.hbm [resolvable:$true] %s53_s29 }
   0x9   :  { %76 = dma.hbm_to_vmem [thread:$0]  %s69_s20, 1024, %s71_s24, [#allocation9], %s1223_s21, %s1223_s21, %s1224_s22  }
   0xa   :  { %s1226_s30 = smov [#allocation2]   ;;  %s1227_s6 = smov [#allocation7]  }
   0xb   :  { %s27_s11 = sshll.u32 %s1226_s30, 4  ;;  %s55_s12 = sshll.u32 %s1227_s6, 4  ;;  %s28_s11 = int_to_ptr.vmem [resolvable:$true] %s27_s11  ;;  %s56_s12 = int_to_ptr.vmem [resolvable:$true] %s55_s12 }
   0xc   :  { %33 = dma.hbm_to_vmem [thread:$0]  %s26_s27, 256, %s28_s11, [#allocation3], %s1223_s21, %s1223_s21, %s1224_s22  }
   0xd   :  { %s83_s15 = sshll.u32 %s1379_s8, 4  ;;  %s1228_s1 = smov [#allocation10]   ;;  %s84_s15 = int_to_ptr.hbm [resolvable:$true] %s83_s15 }
   0xe   :  { %61 = dma.hbm_to_vmem [thread:$0]  %s54_s29, 3072, %s56_s12, [#allocation6], %s1223_s21, %s1223_s21, %s1224_s22  }
   0xf   :  { %s85_s16 = sshll.u32 %s1228_s1, 4  ;;  %s1229_s17 = smov 128   ;;  %s86_s16 = int_to_ptr.vmem [resolvable:$true] %s85_s16 }
  0x10   :  { %s1230_s18 = smov 8  }
  0x11   :  { %91 = dma.hbm_to_vmem [thread:$0]  %s84_s15, 2048, %s86_s16, [#allocation9], %s1229_s17, %s1229_s17, %s1230_s18  }
  0x12   :  { %1214 = dma.done.wait [#allocation3], 256  }
  0x13   :  { %1215 = vsyncadd [#allocation3], 4294967040 }
  0x14   :  { %1216 = dma.done.wait [#allocation6], 3328  }
  0x15   :  { %1217 = vsyncadd [#allocation6], 4294963968 }
  0x16   :  { %1218 = dma.done.wait [#allocation9], 3072  }
  0x17   :  { %1219 = vsyncadd [#allocation9], 4294964224  ;;  %v117_v0 = vlaneseq  ;;  %v1231_v1 = vmov 0   ;;  %v995_v3 = vld [vmem:[#allocation5 + $0x8] sm:$0xff]  ;;  %v115_v5 = vld [vmem:[%s1371_s0] sm:$0x3] }
  0x18   :  { %1056 = vset.pattern.permute.xlu0 %v1231_v1  ;;  %v1003_v6 = vld [vmem:[#allocation7 + $0x38] sm:$0xff]  ;;  %181 = vmatpush.bf16.msra.mxu0 %v995_v3  ;;  %v994_v7 = vld [vmem:[#allocation5] sm:$0xff]  ;;  %v120_v8 = vperm.slane %v115_v5, 0  ;;  %v116_v9 = vrot.slane %v115_v5, 1  ;;  %v992_v15 = vld [vmem:[#allocation2] sm:$0xff]  ;;  %v1232_v16 = vmov 0.0  }
  0x19   :  { %v1304_v2 = vshrl.u32 %v117_v0, 7  ;;  %v1011_v10 = vld [vmem:[#allocation7 + $0x78] sm:$0xff]  ;;  %288 = vmatpush.bf16.msra.mxu1 %v1003_v6  ;;  %v1002_v12 = vld [vmem:[#allocation7 + $0x30] sm:$0xff]  ;;  %vm168_vm2 = vcmask 261120   ;;  %v1001_v21 = vld [vmem:[#allocation7 + $0x28] sm:$0xff]  ;;  %vm557_vm7 = vcmask 1041409  }
  0x1a   :  { %v1019_v11 = vld [vmem:[#allocation7 + $0xb8] sm:$0xff]  ;;  %v121_v13 = vperm.slane %v116_v9, 0  ;;  %381 = vmatpush.bf16.msra.mxu2 %v1011_v10  ;;  %v1010_v14 = vld [vmem:[#allocation7 + $0x70] sm:$0xff]  ;;  %v1009_v22 = vld [vmem:[#allocation7 + $0x68] sm:$0xff]  ;;  %s1233_s24 = smov [#allocation11]   ;;  %s766_s27 = sshll.u32 %s1381_s10, 4  ;;  %s767_s27 = int_to_ptr.hbm [resolvable:$true] %s766_s27 }
  0x1b   :  { %v119_v4 = vadd.s32 8, %v1304_v2  ;;  %vm122_vm0 = vcmp.lt.s32.totalorder %v1304_v2, %v120_v8  ;;  %469 = vmatpush.bf16.msra.mxu3 %v1019_v11  ;;  %v1018_v19 = vld [vmem:[#allocation7 + $0xb0] sm:$0xff]  ;;  %v1017_v25 = vld [vmem:[#allocation7 + $0xa8] sm:$0xff]  ;;  %v1000_v26 = vld [vmem:[#allocation7 + $0x20] sm:$0xff]  ;;  %vm311_vm5 = vcmp.lt.s32.totalorder %v1304_v2, 1  ;;  %vm492_vm6 = vcmp.lt.s32.totalorder %v1304_v2, 7 }
  0x1c   :  { %v778_v17 = vsel %vm122_vm0, 1.0, %v1232_v16  ;;  %182 = vmatpush.bf16.msra.mxu0 %v994_v7  ;;  %vm124_vm3 = vcmp.lt.s32.totalorder %v1304_v2, %v121_v13  ;;  %v1008_v28 = vld [vmem:[#allocation7 + $0x60] sm:$0xff]  ;;  %v993_v30 = vld [vmem:[#allocation2 + $0x8] sm:$0xff]  ;;  %v999_v31 = vld [vmem:[#allocation7 + $0x18] sm:$0xff]  ;;  %s764_s25 = sshll.u32 %s1233_s24, 4  ;;  %vm755_vm8 = vcmask 1041408   ;;  %s765_s25 = int_to_ptr.vmem [resolvable:$true] %s764_s25 }
  0x1d   :  { %vm123_vm1 = vcmp.lt.s32.totalorder %v119_v4, %v120_v8  ;;  %vm125_vm4 = vcmp.lt.s32.totalorder %v119_v4, %v121_v13  ;;  %289 = vmatpush.bf16.msra.mxu1 %v1002_v12  ;;  %v780_v23 = vsel %vm124_vm3, 1.0, %v1232_v16  ;;  %v1016_v29 = vld [vmem:[#allocation7 + $0xa0] sm:$0xff]  ;;  %v1007_v32 = vld [vmem:[#allocation7 + $0x58] sm:$0xff]  ;;  %v998_v34 = vld [vmem:[#allocation7 + $0x10] sm:$0xff] }
  0x1e   :  { %v779_v18 = vsel %vm123_vm1, 1.0, %v1232_v16  ;;  %382 = vmatpush.bf16.msra.mxu2 %v1010_v14  ;;  %v781_v24 = vsel %vm125_vm4, 1.0, %v1232_v16  ;;  %v1015_v33 = vld [vmem:[#allocation7 + $0x98] sm:$0xff]  ;;  %v1006_v35 = vld [vmem:[#allocation7 + $0x50] sm:$0xff]  ;;  %v997_v37 = vld [vmem:[#allocation7 + $0x8] sm:$0xff] }
  0x1f   :  { %v1057_v20 = vpack.i.bf16 %v779_v18, %v778_v17  ;;  %798 = vmatmul.msk.bf16.vlgmr.msra.gmra.mxu0 %vm168_vm2, %v992_v15  ;;  %470 = vmatpush.bf16.msra.mxu3 %v1018_v19  ;;  %v1062_v27 = vpack.i.bf16 %v781_v24, %v780_v23  ;;  %v1014_v36 = vld [vmem:[#allocation7 + $0x90] sm:$0xff]  ;;  %v1005_v38 = vld [vmem:[#allocation7 + $0x48] sm:$0xff]  ;;  %v996_v40 = vld [vmem:[#allocation7] sm:$0xff] }
  0x20   :  { %v1013_v39 = vld [vmem:[#allocation7 + $0x88] sm:$0xff]  ;;  %v1004_v41 = vld [vmem:[#allocation7 + $0x40] sm:$0xff]  ;;  %v1027_v5 = vld [vmem:[#allocation8 + $0x38] sm:$0xff] }
  0x21   :  { %1058 = vperm.xlu0 %1056, %v1057_v20   ;;  %290 = vmatpush.bf16.msra.mxu1 %v1001_v21  ;;  %v1012_v42 = vld [vmem:[#allocation7 + $0x80] sm:$0xff]  ;;  %v1026_v7 = vld [vmem:[#allocation8 + $0x30] sm:$0xff]  ;;  %v1025_v10 = vld [vmem:[#allocation8 + $0x28] sm:$0xff] }
  0x22   :  { %383 = vmatpush.bf16.msra.mxu2 %v1009_v22  ;;  %v1067_v44 = vld [vmem:[%s1374_s3] ss:$0 sm:$0xff]  ;;  %609 = vmatpush.bf16.msrb.mxu0 %v1027_v5  ;;  %v1023_v13 = vld [vmem:[#allocation8 + $0x18] sm:$0xff]  ;;  %v1022_v17 = vld [vmem:[#allocation8 + $0x10] sm:$0xff] }
  0x23   :  { %471 = vmatpush.bf16.msra.mxu3 %v1017_v25  ;;  %v1024_v12 = vld [vmem:[#allocation8 + $0x20] sm:$0xff]  ;;  %v1021_v19 = vld [vmem:[#allocation8 + $0x8] sm:$0xff] }
  0x25   :  { %291 = vmatpush.bf16.msra.mxu1 %v1000_v26 }
  0x26   :  { %384 = vmatpush.bf16.msra.mxu2 %v1008_v28  ;;  %610 = vmatpush.bf16.msrb.mxu0 %v1026_v7  ;;  %v1068_v28 = vld [vmem:[%s1376_s5] ss:$0 sm:$0xff]  ;;  %v1041_v7 = vld [vmem:[#allocation10 + $0x64] sm:$0xf0] }
  0x27   :  { %472 = vmatpush.bf16.msra.mxu3 %v1016_v29 }
  0x29   :  { %1063 = vperm.xlu0 %1056, %v1062_v27   ;;  %292 = vmatpush.bf16.msra.mxu1 %v999_v31 }
  0x2a   :  { %385 = vmatpush.bf16.msra.mxu2 %v1007_v32  ;;  %611 = vmatpush.bf16.msrb.mxu0 %v1025_v10 }
  0x2b   :  { %473 = vmatpush.bf16.msra.mxu3 %v1015_v33 }
  0x2d   :  { %293 = vmatpush.bf16.msra.mxu1 %v998_v34 }
  0x2e   :  { %386 = vmatpush.bf16.msra.mxu2 %v1006_v35  ;;  %612 = vmatpush.bf16.msrb.mxu0 %v1024_v12  ;;  %v972_v12 = vld [vmem:[#allocation10 + $0x58] sm:$0xf0] }
  0x2f   :  { %799 = vmatmul.msk.bf16.gmra.mxu0 %vm168_vm2, %v993_v30  ;;  %474 = vmatpush.bf16.msra.mxu3 %v1014_v36  ;;  %v1020_v30 = vld [vmem:[#allocation8] sm:$0xff] }
  0x31   :  { %294 = vmatpush.bf16.msra.mxu1 %v997_v37 }
  0x32   :  { %387 = vmatpush.bf16.msra.mxu2 %v1005_v38  ;;  %613 = vmatpush.bf16.msrb.mxu0 %v1023_v13 }
  0x33   :  { %475 = vmatpush.bf16.msra.mxu3 %v1013_v39 }
  0x35   :  { %295 = vmatpush.bf16.msra.mxu1 %v996_v40 }
  0x36   :  { %388 = vmatpush.bf16.msra.mxu2 %v1004_v41  ;;  %614 = vmatpush.bf16.msrb.mxu0 %v1022_v17 }
  0x37   :  { %476 = vmatpush.bf16.msra.mxu3 %v1012_v42 }
  0x3a   :  { %615 = vmatpush.bf16.msrb.mxu0 %v1021_v19 }
  0x3e   :  { %616 = vmatpush.bf16.msrb.mxu0 %v1020_v30  ;;  %v1034_v30 = vld [vmem:[#allocation10 + $0x34] sm:$0xf] }
  0x93   :  { %v1317_v46 = vpop.permute.xlu0 %1058 }
  0x94   :  { %v1061_v49 = vunpack.i.h.bf16 %v1317_v46  ;;  %v1060_v50 = vunpack.i.l.bf16 %v1317_v46 }
  0x9b   :  { %v1325_v58 = vpop.permute.xlu0 %1063 }
  0x9c   :  { %v184_v43 = vpop.f32.mrf.mxu0  ;;  %v1066_v62 = vunpack.i.h.bf16 %v1325_v58  ;;  %v1065_v63 = vunpack.i.l.bf16 %v1325_v58 }
  0x9d   :  { %v185_v45 = vadd.f32 %v1067_v44, %v184_v43 }
  0x9f   :  { %v194_v48 = vmax.f32 %v185_v45, 0.0 }
  0xa1   :  { %v218_v53 = vmul.f32 %v1060_v50, %v194_v48 }
  0xa4   :  { %v186_v47 = vpop.f32.mrf.mxu0 }
  0xa5   :  { %v187_v51 = vadd.f32 %v1067_v44, %v186_v47 }
  0xa7   :  { %v195_v52 = vmax.f32 %v187_v51, 0.0  ;;  %v1042_v51 = vld [vmem:[#allocation10 + $0x74] sm:$0xf] }
  0xa9   :  { %v219_v54 = vmul.f32 %v1061_v49, %v195_v52  ;;  %v988_v52 = vld [vmem:[#allocation10 + $0x78] sm:$0xf0] }
  0xab   :  { %v222_v55 = vpack.c.bf16 %v219_v54, %v218_v53  ;;  %v991_v54 = vor.u32 %v1042_v51, %v988_v52 }
  0xac   :  { %v189_v56 = vpop.f32.mrf.mxu0 }
  0xad   :  { %296 = vmatmul.bf16.vlgmr.msra.gmra.mxu1 %v222_v55  ;;  %389 = vmatmul.bf16.vlgmr.msra.gmra.mxu2 %v222_v55  ;;  %v190_v57 = vadd.f32 %v1067_v44, %v189_v56  ;;  %v1043_v56 = vld [vmem:[#allocation10 + $0x74] sm:$0xf0] }
  0xae   :  { %477 = vmatmul.bf16.vlgmr.msra.gmra.mxu3 %v222_v55  ;;  %v986_v55 = vld [vmem:[#allocation10 + $0x70] sm:$0xf]  ;;  %739 = vmatpush.bf16.msrb.mxu2 %v991_v54 }
  0xaf   :  { %v196_v60 = vmax.f32 %v190_v57, 0.0  ;;  %v1040_v57 = vld [vmem:[#allocation10 + $0x64] sm:$0xf] }
  0xb1   :  { %v220_v1 = vmul.f32 %v1065_v63, %v196_v60 }
  0xb4   :  { %v191_v59 = vpop.f32.mrf.mxu0 }
  0xb5   :  { %v192_v61 = vadd.f32 %v1067_v44, %v191_v59 }
  0xb7   :  { %v197_v0 = vmax.f32 %v192_v61, 0.0 }
  0xb9   :  { %v221_v3 = vmul.f32 %v1066_v62, %v197_v0  ;;  %v987_v0 = vor.u32 %v1043_v56, %v986_v55 }
  0xbb   :  { %v223_v4 = vpack.c.bf16 %v221_v3, %v220_v1  ;;  %v980_v1 = vld [vmem:[#allocation10 + $0x68] sm:$0xf0]  ;;  %v978_v3 = vld [vmem:[#allocation10 + $0x60] sm:$0xf]  ;;  %726 = vmatpush.bf16.msrb.mxu1 %v987_v0  ;;  %v1031_v0 = vld [vmem:[#allocation10 + $0x14] sm:$0xf0] }
  0xbc   :  { %v979_v10 = vor.u32 %v1041_v7, %v978_v3  ;;  %v1028_v3 = vld [vmem:[#allocation10 + $0x4] sm:$0xf]  ;;  %v1029_v7 = vld [vmem:[#allocation10 + $0x4] sm:$0xf0] }
  0xbd   :  { %301 = vmatmul.bf16.gmra.mxu1 %v223_v4  ;;  %394 = vmatmul.bf16.gmra.mxu2 %v223_v4 }
  0xbe   :  { %482 = vmatmul.bf16.gmra.mxu3 %v223_v4 }
  0xbf   :  { %727 = vmatpush.bf16.msrb.mxu1 %v979_v10 }
 0x12a   :  { %v297_v6 = vpop.f32.mrf.mxu1 }
 0x12b   :  { %v307_v20 = vrot.slane %v297_v6, 7  ;;  %v983_v6 = vor.u32 %v1040_v57, %v980_v1 }
 0x12d   :  { %740 = vmatpush.bf16.msrb.mxu2 %v983_v6 }
 0x130   :  { %v390_v8 = vpop.f32.mrf.mxu2 }
 0x131   :  { %v478_v9 = vpop.f32.mrf.mxu3 }
 0x132   :  { %v299_v11 = vpop.f32.mrf.mxu1  ;;  %v488_v32 = vrot.slane %v478_v9, 1 }
 0x133   :  { %v308_v18 = vrot.slane %v299_v11, 7  ;;  %v1038_v11 = vld [vmem:[#allocation10 + $0x54] sm:$0xf] }
 0x134   :  { %v975_v19 = vor.u32 %v1038_v11, %v972_v12 }
 0x135   :  { %v314_v23 = vsel %vm311_vm5, %v307_v20, %v308_v18 }
 0x136   :  { %741 = vmatpush.bf16.msrb.mxu2 %v975_v19 }
 0x138   :  { %v392_v14 = vpop.f32.mrf.mxu2 }
 0x139   :  { %v480_v15 = vpop.f32.mrf.mxu3  ;;  %v401_v27 = vadd.f32 %v392_v14, %v314_v23  ;;  %v970_v14 = vld [vmem:[#allocation10 + $0x50] sm:$0xf]  ;;  %v962_v23 = vld [vmem:[#allocation10 + $0x40] sm:$0xf] }
 0x13a   :  { %v302_v16 = vpop.f32.mrf.mxu1  ;;  %v489_v24 = vrot.slane %v480_v15, 1  ;;  %v1039_v15 = vld [vmem:[#allocation10 + $0x54] sm:$0xf0] }
 0x13b   :  { %v309_v35 = vrot.slane %v302_v16, 7 }
 0x13c   :  { %v495_v37 = vsel %vm492_vm6, %v488_v32, %v489_v24 }
 0x13d   :  { %v313_v44 = vsel %vm311_vm5, %v308_v18, %v309_v35 }
 0x140   :  { %v395_v21 = vpop.f32.mrf.mxu2 }
 0x141   :  { %v483_v22 = vpop.f32.mrf.mxu3  ;;  %v402_v53 = vadd.f32 %v395_v21, %v313_v44  ;;  %v971_v21 = vor.u32 %v1039_v15, %v970_v14  ;;  %v640_v15 = vld [vmem:[%s1380_s9] sm:$0x3] }
 0x142   :  { %v490_v25 = vrot.slane %v483_v22, 1  ;;  %v304_v26 = vpop.f32.mrf.mxu1  ;;  %v964_v22 = vld [vmem:[#allocation10 + $0x48] sm:$0xf0] }
 0x143   :  { %v310_v29 = vrot.slane %v304_v26, 7  ;;  %728 = vmatpush.bf16.msrb.mxu1 %v971_v21 }
 0x144   :  { %v494_v31 = vsel %vm492_vm6, %v489_v24, %v490_v25  ;;  %v1037_v24 = vld [vmem:[#allocation10 + $0x44] sm:$0xf0] }
 0x145   :  { %v498_v33 = vadd.f32 %v494_v31, %v401_v27  ;;  %v315_v34 = vsel %vm311_vm5, %v310_v29, %v307_v20  ;;  %v312_v40 = vsel %vm311_vm5, %v309_v35, %v310_v29  ;;  %v963_v29 = vor.u32 %v1037_v24, %v962_v23  ;;  %v956_v31 = vld [vmem:[#allocation10 + $0x38] sm:$0xf0] }
 0x146   :  { %v400_v36 = vadd.f32 %v390_v8, %v315_v34  ;;  %v1035_v34 = vld [vmem:[#allocation10 + $0x34] sm:$0xf0] }
 0x147   :  { %v506_v38 = vadd.f32 %v1068_v28, %v498_v33  ;;  %v954_v33 = vld [vmem:[#allocation10 + $0x30] sm:$0xf]  ;;  %729 = vmatpush.bf16.msrb.mxu1 %v963_v29 }
 0x148   :  { %v497_v39 = vadd.f32 %v495_v37, %v400_v36  ;;  %v397_v41 = vpop.f32.mrf.mxu2  ;;  %v1032_v37 = vld [vmem:[#allocation10 + $0x24] sm:$0xf] }
 0x149   :  { %v403_v42 = vadd.f32 %v397_v41, %v312_v40  ;;  %v485_v43 = vpop.f32.mrf.mxu3  ;;  %v510_v45 = vmax.f32 %v506_v38, 0.0  ;;  %v948_v38 = vld [vmem:[#allocation10 + $0x28] sm:$0xf0]  ;;  %v946_v40 = vld [vmem:[#allocation10 + $0x20] sm:$0xf] }
 0x14a   :  { %v505_v47 = vadd.f32 %v1068_v28, %v497_v39  ;;  %v491_v48 = vrot.slane %v485_v43, 1  ;;  %v1033_v41 = vld [vmem:[#allocation10 + $0x24] sm:$0xf0]  ;;  %v951_v44 = vor.u32 %v1032_v37, %v948_v38 }
 0x14b   :  { %v514_v8 = vmul.f32 %v1061_v49, %v510_v45  ;;  %v1036_v49 = vld [vmem:[#allocation10 + $0x44] sm:$0xf]  ;;  %v947_v45 = vor.u32 %v1033_v41, %v946_v40 }
 0x14c   :  { %v509_v59 = vmax.f32 %v505_v47, 0.0  ;;  %v493_v60 = vsel %vm492_vm6, %v490_v25, %v491_v48  ;;  %v496_v61 = vsel %vm492_vm6, %v491_v48, %v488_v32  ;;  %v967_v27 = vor.u32 %v1036_v49, %v964_v22  ;;  %v1030_v47 = vld [vmem:[#allocation10 + $0x14] sm:$0xf]  ;;  %v940_v48 = vld [vmem:[#allocation10 + $0x18] sm:$0xf0] }
 0x14d   :  { %v499_v4 = vadd.f32 %v493_v60, %v402_v53  ;;  %v500_v5 = vadd.f32 %v496_v61, %v403_v42  ;;  %v943_v54 = vor.u32 %v1030_v47, %v940_v48  ;;  %v938_v61 = vld [vmem:[#allocation10 + $0x10] sm:$0xf] }
 0x14e   :  { %v513_v9 = vmul.f32 %v1060_v50, %v509_v59  ;;  %742 = vmatpush.bf16.msrb.mxu2 %v967_v27  ;;  %v939_v1 = vor.u32 %v1031_v0, %v938_v61 }
 0x14f   :  { %v507_v2 = vadd.f32 %v1068_v28, %v499_v4  ;;  %v508_v13 = vadd.f32 %v1068_v28, %v500_v5  ;;  %v932_v4 = vld [vmem:[#allocation10 + $0x8] sm:$0xf0]  ;;  %v930_v5 = vld [vmem:[#allocation10] sm:$0xf] }
 0x150   :  { %v517_v16 = vmax.f32 %v513_v9, %v514_v8  ;;  %v935_v6 = vor.u32 %v1028_v3, %v932_v4  ;;  %v931_v8 = vor.u32 %v1029_v7, %v930_v5  ;;  %v1069_v9 = vld [vmem:[%s1378_s7] ss:$0 sm:$0xff] }
 0x151   :  { %v511_v17 = vmax.f32 %v507_v2, 0.0  ;;  %v512_v18 = vmax.f32 %v508_v13, 0.0 }
 0x152   :  { %v518_v20 = vrot.slane %v517_v16, 4 }
 0x153   :  { %v515_v46 = vmul.f32 %v1065_v63, %v511_v17  ;;  %v516_v50 = vmul.f32 %v1066_v62, %v512_v18  ;;  %v959_v63 = vor.u32 %v1034_v30, %v956_v31  ;;  %v955_v62 = vor.u32 %v1035_v34, %v954_v33 }
 0x154   :  { %v519_v25 = vmax.f32 %v517_v16, %v518_v20  ;;  %v643_v16 = vperm.slane %v640_v15, 1  ;;  %v642_v17 = vperm.slane %v640_v15, 0 }
 0x155   :  { %v524_v26 = vmax.f32 %v515_v46, %v516_v50  ;;  %743 = vmatpush.bf16.msrb.mxu2 %v959_v63  ;;  %730 = vmatpush.bf16.msrb.mxu1 %v955_v62 }
 0x156   :  { %v520_v28 = vrot.slane %v519_v25, 2 }
 0x157   :  { %v525_v32 = vrot.slane %v524_v26, 4 }
 0x158   :  { %v521_v35 = vmax.f32 %v519_v25, %v520_v28 }
 0x159   :  { %v526_v36 = vmax.f32 %v524_v26, %v525_v32  ;;  %744 = vmatpush.bf16.msrb.mxu2 %v951_v44  ;;  %731 = vmatpush.bf16.msrb.mxu1 %v947_v45 }
 0x15a   :  { %v522_v58 = vrot.slane %v521_v35, 1 }
 0x15b   :  { %v527_v39 = vrot.slane %v526_v36, 2 }
 0x15c   :  { %v523_v42 = vmax.f32 %v521_v35, %v522_v58 }
 0x15d   :  { %v528_v43 = vmax.f32 %v526_v36, %v527_v39  ;;  %745 = vmatpush.bf16.msrb.mxu2 %v943_v54  ;;  %732 = vmatpush.bf16.msrb.mxu1 %v939_v1 }
 0x15e   :  { %v531_v53 = vpack.c.bf16 %v523_v42, %v523_v42 }
 0x15f   :  { %v529_v51 = vrot.slane %v528_v43, 1 }
 0x160   :  { %v555_v56 = vunpack.c.l.b16 %v531_v53 }
 0x161   :  { %v530_v52 = vmax.f32 %v528_v43, %v529_v51  ;;  %746 = vmatpush.bf16.msrb.mxu2 %v935_v6  ;;  %733 = vmatpush.bf16.msrb.mxu1 %v931_v8 }
 0x163   :  { %v532_v55 = vpack.c.bf16 %v530_v52, %v530_v52 }
 0x165   :  { %v556_v57 = vunpack.c.l.b16 %v532_v55 }
 0x167   :  { %v558_v59 = vsel %vm557_vm7, %v556_v57, %v555_v56 }
 0x168   :  { %v559_v60 = vpack.c.b16 %v558_v59, %v558_v59 }
 0x16a   :  { %617 = vmatmul.bf16.vlgmr.msrb.gmra.mxu0 %v559_v60 }
 0x1e7   :  { %v618_v10 = vpop.f32.mrf.mxu0 }
 0x1e8   :  { %v619_v11 = vadd.f32 %v1069_v9, %v618_v10 }
 0x1ea   :  { %v622_v12 = vmax.f32 %v619_v11, 0.0 }
 0x1ec   :  { %v623_v2 = vpack.c.bf16 %v622_v12, %v622_v12 }
 0x1ee   :  { %734 = vmatmul.bf16.vlgmr.msrb.gmra.mxu1 %v623_v2  ;;  %747 = vmatmul.bf16.vlgmr.msrb.gmra.mxu2 %v623_v2 }
 0x1ef   :  { %v620_v13 = vpop.f32.mrf.mxu0 }
 0x26b   :  { %v735_v14 = vpop.f32.mrf.mxu1 }
 0x26c   :  { %v736_v21 = vadd.f32 %v735_v14, %v642_v17 }
 0x271   :  { %v748_v18 = vpop.f32.mrf.mxu2 }
 0x272   :  { %v749_v19 = vadd.f32 %v748_v18, %v643_v16 }
 0x273   :  { %v737_v20 = vpop.f32.mrf.mxu1 }
 0x274   :  { %v754_v49 = vrot.slane %v749_v19, 6 }
 0x276   :  { %v756_v22 = vsel %vm755_vm8, %v736_v21, %v754_v49 }
 0x277   :  { %758 = vst [vmem:[#allocation11] sm:$0xf] %v756_v22 }
 0x278   :  { %769 = dma.vmem_to_hbm [thread:$0]  %s765_s25, 64, %s767_s27, [#allocation4]  }
 0x279   :  { %v750_v46 = vpop.f32.mrf.mxu2 }
 0x27a   :  { %1220 = dma.done.wait [#allocation4], 64  }
 0x27b   :  { %1221 = vsyncadd [#allocation4], 4294967232 }
 0x27c   :  { %774 = vsyncpa [#allocation3], 1 }
 0x27d   :  { %775 = vsyncpa [#allocation6], 1 }
 0x27e   :  { %776 = vsyncpa [#allocation9], 1 }
 0x27f   :  { %777 = vsyncpa [#allocation4], 1 }

// kernel: tpu_custom_call.1
= control target key start
LH: loop header
LB: loop body
LE: loop exit
PB: predicated region body
PF: predicated region fallthrough
CT: control target
= control target key end

     0   :  { %15 = vsyncpa [#allocation4], 0  ;;  %s1348_s0 = inlined_call_operand.vmem [shape: s32[2,1], index: 0, kind: input, shape index: {}]   ;;  %s1349_s1 = inlined_call_operand.hbm [shape: bf16[2,16,32], index: 1, kind: input, shape index: {}]   ;;  %s1350_s2 = inlined_call_operand.hbm [shape: bf16[32,128], index: 2, kind: input, shape index: {}]   ;;  %s1351_s3 = inlined_call_operand.vmem [shape: f32[1,128], index: 3, kind: input, shape index: {}]   ;;  %s1352_s4 = inlined_call_operand.hbm [shape: bf16[3,128,128], index: 4, kind: input, shape index: {}]   ;;  %s1353_s5 = inlined_call_operand.vmem [shape: f32[1,128], index: 5, kind: input, shape index: {}]   ;;  %s1354_s6 = inlined_call_operand.hbm [shape: bf16[128,128], index: 6, kind: input, shape index: {}]   ;;  %s1355_s7 = inlined_call_operand.vmem [shape: f32[1,128], index: 7, kind: input, shape index: {}]   ;;  %s1356_s8 = inlined_call_operand.hbm [shape: bf16[128,256], index: 8, kind: input, shape index: {}]   ;;  %s1357_s9 = inlined_call_operand.vmem [shape: f32[1,256], index: 9, kind: input, shape index: {}]   ;;  %s1358_s10 = inlined_call_operand.hbm [shape: f32[2,256], index: 10, kind: output, shape index: {}]  }
   0x1   :  { %16 = vsyncpa [#allocation7], 0 }
   0x2   :  { %17 = vsyncpa [#allocation10], 0 }
   0x3   :  { %18 = vsyncpa [#allocation5], 0  ;;  %s38_s15 = sshll.u32 %s1350_s2, 4  ;;  %s1224_s16 = smov [#allocation6]   ;;  %s39_s15 = int_to_ptr.hbm [resolvable:$true] %s38_s15 }
   0x4   :  { %s40_s17 = sshll.u32 %s1224_s16, 4  ;;  %s68_s20 = sshll.u32 %s1354_s6, 4  ;;  %s41_s17 = int_to_ptr.vmem [resolvable:$true] %s40_s17  ;;  %s69_s20 = int_to_ptr.hbm [resolvable:$true] %s68_s20 }
   0x5   :  { %s1225_s21 = smov 64   ;;  %s1226_s22 = smov 4  }
   0x6   :  { %46 = dma.hbm_to_vmem [thread:$0]  %s39_s15, 256, %s41_s17, [#allocation7], %s1225_s21, %s1225_s21, %s1226_s22  }
   0x7   :  { %s1227_s23 = smov [#allocation9]   ;;  %s25_s27 = sshll.u32 %s1349_s1, 4  ;;  %s26_s27 = int_to_ptr.hbm [resolvable:$true] %s25_s27 }
   0x8   :  { %s70_s24 = sshll.u32 %s1227_s23, 4  ;;  %s53_s29 = sshll.u32 %s1352_s4, 4  ;;  %s71_s24 = int_to_ptr.vmem [resolvable:$true] %s70_s24  ;;  %s54_s29 = int_to_ptr.hbm [resolvable:$true] %s53_s29 }
   0x9   :  { %76 = dma.hbm_to_vmem [thread:$0]  %s69_s20, 1024, %s71_s24, [#allocation10], %s1225_s21, %s1225_s21, %s1226_s22  }
   0xa   :  { %s1228_s30 = smov [#allocation3]   ;;  %s1229_s6 = smov [#allocation8]  }
   0xb   :  { %s27_s11 = sshll.u32 %s1228_s30, 4  ;;  %s55_s12 = sshll.u32 %s1229_s6, 4  ;;  %s28_s11 = int_to_ptr.vmem [resolvable:$true] %s27_s11  ;;  %s56_s12 = int_to_ptr.vmem [resolvable:$true] %s55_s12 }
   0xc   :  { %33 = dma.hbm_to_vmem [thread:$0]  %s26_s27, 256, %s28_s11, [#allocation4], %s1225_s21, %s1225_s21, %s1226_s22  }
   0xd   :  { %s83_s15 = sshll.u32 %s1356_s8, 4  ;;  %s1230_s1 = smov [#allocation11]   ;;  %s84_s15 = int_to_ptr.hbm [resolvable:$true] %s83_s15 }
   0xe   :  { %61 = dma.hbm_to_vmem [thread:$0]  %s54_s29, 3072, %s56_s12, [#allocation7], %s1225_s21, %s1225_s21, %s1226_s22  }
   0xf   :  { %s85_s16 = sshll.u32 %s1230_s1, 4  ;;  %s1231_s17 = smov 128   ;;  %s86_s16 = int_to_ptr.vmem [resolvable:$true] %s85_s16 }
  0x10   :  { %s1232_s18 = smov 8  }
  0x11   :  { %91 = dma.hbm_to_vmem [thread:$0]  %s84_s15, 2048, %s86_s16, [#allocation10], %s1231_s17, %s1231_s17, %s1232_s18  }
  0x12   :  { %1216 = dma.done.wait [#allocation4], 256  }
  0x13   :  { %1217 = vsyncadd [#allocation4], 4294967040 }
  0x14   :  { %1218 = dma.done.wait [#allocation7], 3328  }
  0x15   :  { %1219 = vsyncadd [#allocation7], 4294963968 }
  0x16   :  { %1220 = dma.done.wait [#allocation10], 3072  }
  0x17   :  { %1221 = vsyncadd [#allocation10], 4294964224  ;;  %v117_v0 = vlaneseq  ;;  %v1233_v1 = vmov 0   ;;  %v1234_v2 = vmov 0.0   ;;  %v997_v4 = vld [vmem:[#allocation6 + $0x8] sm:$0xff]  ;;  %v996_v8 = vld [vmem:[#allocation6] sm:$0xff] }
  0x18   :  { %1058 = vset.pattern.permute.xlu0 %v1233_v1  ;;  %222 = vst [vmem:[#allocation2] sm:$0x1] %v1234_v2  ;;  %v115_v6 = vld [vmem:[%s1348_s0] sm:$0x3]  ;;  %v1013_v7 = vld [vmem:[#allocation8 + $0x78] sm:$0xff]  ;;  %181 = vmatpush.bf16.msra.mxu0 %v997_v4  ;;  %v994_v16 = vld [vmem:[#allocation3] sm:$0xff] }
  0x19   :  { %223 = vst [vmem:[#allocation2 + $0x18] sm:$0x1] %v1234_v2  ;;  %v118_v3 = vshrl.u32 %v117_v0, 7  ;;  %v120_v9 = vperm.slane %v115_v6, 0  ;;  %v116_v10 = vrot.slane %v115_v6, 1  ;;  %v1005_v11 = vld [vmem:[#allocation8 + $0x38] sm:$0xff]  ;;  %323 = vmatpush.bf16.msra.mxu1 %v1013_v7 }
  0x1a   :  { %224 = vst [vmem:[#allocation2 + $0x11] sm:$0x1] %v1234_v2  ;;  %v1021_v12 = vld [vmem:[#allocation8 + $0xb8] sm:$0xff]  ;;  %v1012_v13 = vld [vmem:[#allocation8 + $0x70] sm:$0xff]  ;;  %390 = vmatpush.bf16.msra.mxu2 %v1005_v11  ;;  %vm168_vm2 = vcmask 261120   ;;  %v995_v24 = vld [vmem:[#allocation3 + $0x8] sm:$0xff] }
  0x1b   :  { %225 = vst [vmem:[#allocation2 + $0x29] sm:$0x1] %v1234_v2  ;;  %v119_v5 = vadd.s32 8, %v118_v3  ;;  %vm122_vm0 = vcmp.lt.s32.totalorder %v118_v3, %v120_v9  ;;  %v121_v14 = vperm.slane %v116_v10, 0  ;;  %480 = vmatpush.bf16.msra.mxu3 %v1021_v12  ;;  %v1004_v15 = vld [vmem:[#allocation8 + $0x30] sm:$0xff]  ;;  %v1011_v25 = vld [vmem:[#allocation8 + $0x68] sm:$0xff] }
  0x1c   :  { %v780_v17 = vsel %vm122_vm0, 1.0, %v1234_v2  ;;  %v1020_v19 = vld [vmem:[#allocation8 + $0xb0] sm:$0xff]  ;;  %182 = vmatpush.bf16.msra.mxu0 %v996_v8  ;;  %v1010_v26 = vld [vmem:[#allocation8 + $0x60] sm:$0xff]  ;;  %v1003_v27 = vld [vmem:[#allocation8 + $0x28] sm:$0xff]  ;;  %vm559_vm5 = vcmask 1041409   ;;  %s1235_s24 = smov [#allocation12]  }
  0x1d   :  { %vm123_vm1 = vcmp.lt.s32.totalorder %v119_v5, %v120_v9  ;;  %vm124_vm3 = vcmp.lt.s32.totalorder %v118_v3, %v121_v14  ;;  %vm125_vm4 = vcmp.lt.s32.totalorder %v119_v5, %v121_v14  ;;  %324 = vmatpush.bf16.msra.mxu1 %v1012_v13  ;;  %v1019_v28 = vld [vmem:[#allocation8 + $0xa8] sm:$0xff]  ;;  %v1009_v29 = vld [vmem:[#allocation8 + $0x58] sm:$0xff]  ;;  %v1002_v30 = vld [vmem:[#allocation8 + $0x20] sm:$0xff]  ;;  %s766_s25 = sshll.u32 %s1235_s24, 4  ;;  %s768_s27 = sshll.u32 %s1358_s10, 4  ;;  %vm757_vm6 = vcmask 1041408   ;;  %s767_s25 = int_to_ptr.vmem [resolvable:$true] %s766_s25  ;;  %s769_s27 = int_to_ptr.hbm [resolvable:$true] %s768_s27 }
  0x1e   :  { %v781_v18 = vsel %vm123_vm1, 1.0, %v1234_v2  ;;  %391 = vmatpush.bf16.msra.mxu2 %v1004_v15  ;;  %v782_v21 = vsel %vm124_vm3, 1.0, %v1234_v2  ;;  %v783_v22 = vsel %vm125_vm4, 1.0, %v1234_v2  ;;  %v1018_v31 = vld [vmem:[#allocation8 + $0xa0] sm:$0xff]  ;;  %v1008_v32 = vld [vmem:[#allocation8 + $0x50] sm:$0xff]  ;;  %v1001_v33 = vld [vmem:[#allocation8 + $0x18] sm:$0xff] }
  0x1f   :  { %v1059_v20 = vpack.i.bf16 %v781_v18, %v780_v17  ;;  %800 = vmatmul.msk.bf16.vlgmr.msra.gmra.mxu0 %vm168_vm2, %v994_v16  ;;  %481 = vmatpush.bf16.msra.mxu3 %v1020_v19  ;;  %v1064_v23 = vpack.i.bf16 %v783_v22, %v782_v21  ;;  %v1017_v34 = vld [vmem:[#allocation8 + $0x98] sm:$0xff]  ;;  %v1007_v35 = vld [vmem:[#allocation8 + $0x48] sm:$0xff]  ;;  %v1000_v36 = vld [vmem:[#allocation8 + $0x10] sm:$0xff] }
  0x20   :  { %v1016_v37 = vld [vmem:[#allocation8 + $0x90] sm:$0xff]  ;;  %v1006_v38 = vld [vmem:[#allocation8 + $0x40] sm:$0xff]  ;;  %v999_v39 = vld [vmem:[#allocation8 + $0x8] sm:$0xff] }
  0x21   :  { %1060 = vperm.xlu0 %1058, %v1059_v20   ;;  %325 = vmatpush.bf16.msra.mxu1 %v1011_v25  ;;  %v1015_v40 = vld [vmem:[#allocation8 + $0x88] sm:$0xff]  ;;  %v998_v41 = vld [vmem:[#allocation8] sm:$0xff]  ;;  %v1069_v43 = vld [vmem:[%s1351_s3] ss:$0 sm:$0xff] }
  0x22   :  { %392 = vmatpush.bf16.msra.mxu2 %v1003_v27  ;;  %v1014_v42 = vld [vmem:[#allocation8 + $0x80] sm:$0xff]  ;;  %v1029_v16 = vld [vmem:[#allocation9 + $0x38] sm:$0xff]  ;;  %v1028_v18 = vld [vmem:[#allocation9 + $0x30] sm:$0xff] }
  0x23   :  { %482 = vmatpush.bf16.msra.mxu3 %v1019_v28  ;;  %611 = vmatpush.bf16.msrb.mxu0 %v1029_v16  ;;  %v1027_v19 = vld [vmem:[#allocation9 + $0x28] sm:$0xff]  ;;  %v1025_v27 = vld [vmem:[#allocation9 + $0x18] sm:$0xff]  ;;  %v1038_v16 = vld [vmem:[#allocation11 + $0x44] sm:$0xf] }
  0x25   :  { %326 = vmatpush.bf16.msra.mxu1 %v1010_v26  ;;  %v1070_v26 = vld [vmem:[%s1353_s5] ss:$0 sm:$0xff] }
  0x26   :  { %393 = vmatpush.bf16.msra.mxu2 %v1002_v30 }
  0x27   :  { %483 = vmatpush.bf16.msra.mxu3 %v1018_v31  ;;  %612 = vmatpush.bf16.msrb.mxu0 %v1028_v18 }
  0x29   :  { %1065 = vperm.xlu0 %1058, %v1064_v23   ;;  %327 = vmatpush.bf16.msra.mxu1 %v1009_v29  ;;  %v1026_v23 = vld [vmem:[#allocation9 + $0x20] sm:$0xff] }
  0x2a   :  { %394 = vmatpush.bf16.msra.mxu2 %v1001_v33  ;;  %v1024_v33 = vld [vmem:[#allocation9 + $0x10] sm:$0xff] }
  0x2b   :  { %484 = vmatpush.bf16.msra.mxu3 %v1017_v34  ;;  %613 = vmatpush.bf16.msrb.mxu0 %v1027_v19 }
  0x2d   :  { %328 = vmatpush.bf16.msra.mxu1 %v1008_v32 }
  0x2e   :  { %395 = vmatpush.bf16.msra.mxu2 %v1000_v36  ;;  %v1023_v36 = vld [vmem:[#allocation9 + $0x8] sm:$0xff] }
  0x2f   :  { %801 = vmatmul.msk.bf16.gmra.mxu0 %vm168_vm2, %v995_v24  ;;  %485 = vmatpush.bf16.msra.mxu3 %v1016_v37 }
  0x30   :  { %614 = vmatpush.bf16.msrb.mxu0 %v1026_v23 }
  0x31   :  { %329 = vmatpush.bf16.msra.mxu1 %v1007_v35 }
  0x32   :  { %396 = vmatpush.bf16.msra.mxu2 %v999_v39 }
  0x33   :  { %486 = vmatpush.bf16.msra.mxu3 %v1015_v40 }
  0x34   :  { %615 = vmatpush.bf16.msrb.mxu0 %v1025_v27  ;;  %v958_v27 = vld [vmem:[#allocation11 + $0x38] sm:$0xf0] }
  0x35   :  { %330 = vmatpush.bf16.msra.mxu1 %v1006_v38 }
  0x36   :  { %397 = vmatpush.bf16.msra.mxu2 %v998_v41 }
  0x37   :  { %487 = vmatpush.bf16.msra.mxu3 %v1014_v42 }
  0x38   :  { %616 = vmatpush.bf16.msrb.mxu0 %v1024_v33  ;;  %v950_v33 = vld [vmem:[#allocation11 + $0x28] sm:$0xf0] }
  0x3c   :  { %617 = vmatpush.bf16.msrb.mxu0 %v1023_v36  ;;  %v1035_v36 = vld [vmem:[#allocation11 + $0x24] sm:$0xf0] }
  0x93   :  { %v1312_v44 = vpop.permute.xlu0 %1060 }
  0x94   :  { %v1062_v47 = vunpack.i.l.bf16 %v1312_v44  ;;  %v1063_v51 = vunpack.i.h.bf16 %v1312_v44 }
  0x9b   :  { %v1320_v56 = vpop.permute.xlu0 %1065 }
  0x9c   :  { %v184_v45 = vpop.f32.mrf.mxu0  ;;  %v1067_v59 = vunpack.i.l.bf16 %v1320_v56  ;;  %v1068_v6 = vunpack.i.h.bf16 %v1320_v56 }
  0x9d   :  { %v185_v46 = vadd.f32 %v1069_v43, %v184_v45  ;;  %v1022_v45 = vld [vmem:[#allocation9] sm:$0xff] }
  0x9e   :  { %618 = vmatpush.bf16.msrb.mxu0 %v1022_v45 }
  0x9f   :  { %v194_v48 = vmax.f32 %v185_v46, 0.0 }
  0xa1   :  { %v218_v49 = vmul.f32 %v1062_v47, %v194_v48 }
  0xa3   :  { %226 = vst [vmem:[#allocation2 + $0x1] sm:$0xff] %v218_v49 }
  0xa4   :  { %v186_v50 = vpop.f32.mrf.mxu0 }
  0xa5   :  { %v187_v52 = vadd.f32 %v1069_v43, %v186_v50 }
  0xa7   :  { %v195_v53 = vmax.f32 %v187_v52, 0.0 }
  0xa9   :  { %v219_v54 = vmul.f32 %v1063_v51, %v195_v53  ;;  %v1044_v53 = vld [vmem:[#allocation11 + $0x74] sm:$0xf] }
  0xaa   :  { %v230_v62 = vld [vmem:[#allocation2] sm:$0xff] }
  0xab   :  { %227 = vst [vmem:[#allocation2 + $0x9] sm:$0xff] %v219_v54  ;;  %v256_v55 = vpack.c.bf16 %v219_v54, %v218_v49  ;;  %v990_v54 = vld [vmem:[#allocation11 + $0x78] sm:$0xf0] }
  0xac   :  { %v189_v57 = vpop.f32.mrf.mxu0 }
  0xad   :  { %v190_v58 = vadd.f32 %v1069_v43, %v189_v57  ;;  %331 = vmatmul.bf16.vlgmr.msra.gmra.mxu1 %v256_v55  ;;  %v988_v55 = vld [vmem:[#allocation11 + $0x70] sm:$0xf] }
  0xaf   :  { %v196_v60 = vmax.f32 %v190_v58, 0.0 }
  0xb1   :  { %v220_v61 = vmul.f32 %v1067_v59, %v196_v60  ;;  %v993_v60 = vor.u32 %v1044_v53, %v990_v54 }
  0xb2   :  { %v231_v63 = vld [vmem:[#allocation2 + $0x8] sm:$0xff] }
  0xb3   :  { %v409_v0 = vld [vmem:[#allocation2 + $0x2] sm:$0xff]  ;;  %v410_v1 = vld [vmem:[#allocation2 + $0xa] sm:$0xff]  ;;  %228 = vst [vmem:[#allocation2 + $0x19] sm:$0xff] %v220_v61  ;;  %v234_v2 = vpack.c.bf16 %v231_v63, %v230_v62  ;;  %741 = vmatpush.bf16.msrb.mxu2 %v993_v60  ;;  %v1030_v60 = vld [vmem:[#allocation11 + $0x4] sm:$0xf] }
  0xb4   :  { %v413_v3 = vpack.c.bf16 %v410_v1, %v409_v0  ;;  %v191_v4 = vpop.f32.mrf.mxu0  ;;  %v980_v63 = vld [vmem:[#allocation11 + $0x60] sm:$0xf]  ;;  %v1043_v0 = vld [vmem:[#allocation11 + $0x64] sm:$0xf0] }
  0xb5   :  { %v192_v5 = vadd.f32 %v1069_v43, %v191_v4  ;;  %398 = vmatmul.bf16.vlgmr.msra.gmra.mxu2 %v234_v2  ;;  %v981_v4 = vor.u32 %v1043_v0, %v980_v63  ;;  %v1071_v63 = vld [vmem:[%s1355_s7] ss:$0 sm:$0xff] }
  0xb6   :  { %488 = vmatmul.bf16.vlgmr.msra.gmra.mxu3 %v413_v3 }
  0xb7   :  { %v197_v7 = vmax.f32 %v192_v5, 0.0  ;;  %v1040_v5 = vld [vmem:[#allocation11 + $0x54] sm:$0xf] }
  0xb9   :  { %v221_v8 = vmul.f32 %v1068_v6, %v197_v7  ;;  %v974_v7 = vld [vmem:[#allocation11 + $0x58] sm:$0xf0] }
  0xba   :  { %v232_v10 = vld [vmem:[#allocation2 + $0x18] sm:$0xff] }
  0xbb   :  { %229 = vst [vmem:[#allocation2 + $0x21] sm:$0xff] %v221_v8  ;;  %v257_v9 = vpack.c.bf16 %v221_v8, %v220_v61  ;;  %v1045_v61 = vld [vmem:[#allocation11 + $0x74] sm:$0xf0] }
  0xbc   :  { %v989_v44 = vor.u32 %v1045_v61, %v988_v55  ;;  %v940_v55 = vld [vmem:[#allocation11 + $0x10] sm:$0xf]  ;;  %v934_v61 = vld [vmem:[#allocation11 + $0x8] sm:$0xf0] }
  0xbd   :  { %336 = vmatmul.bf16.gmra.mxu1 %v257_v9 }
  0xbe   :  { %728 = vmatpush.bf16.msrb.mxu1 %v989_v44  ;;  %v1031_v44 = vld [vmem:[#allocation11 + $0x4] sm:$0xf0] }
  0xc2   :  { %v233_v11 = vld [vmem:[#allocation2 + $0x20] sm:$0xff]  ;;  %729 = vmatpush.bf16.msrb.mxu1 %v981_v4 }
  0xc3   :  { %v411_v12 = vld [vmem:[#allocation2 + $0x1a] sm:$0xff]  ;;  %v412_v13 = vld [vmem:[#allocation2 + $0x22] sm:$0xff]  ;;  %v235_v14 = vpack.c.bf16 %v233_v11, %v232_v10 }
  0xc4   :  { %v414_v15 = vpack.c.bf16 %v412_v13, %v411_v12  ;;  %v972_v10 = vld [vmem:[#allocation11 + $0x50] sm:$0xf]  ;;  %v1041_v11 = vld [vmem:[#allocation11 + $0x54] sm:$0xf0] }
  0xc5   :  { %403 = vmatmul.bf16.gmra.mxu2 %v235_v14  ;;  %v977_v14 = vor.u32 %v1040_v5, %v974_v7  ;;  %v642_v7 = vld [vmem:[%s1357_s9] sm:$0x3] }
  0xc6   :  { %493 = vmatmul.bf16.gmra.mxu3 %v414_v15  ;;  %v973_v15 = vor.u32 %v1041_v11, %v972_v10 }
  0xc8   :  { %730 = vmatpush.bf16.msrb.mxu1 %v973_v15 }
 0x12a   :  { %v332_v17 = vpop.f32.mrf.mxu1 }
 0x132   :  { %v334_v24 = vpop.f32.mrf.mxu1 }
 0x138   :  { %v399_v20 = vpop.f32.mrf.mxu2 }
 0x139   :  { %v489_v21 = vpop.f32.mrf.mxu3  ;;  %v400_v22 = vadd.f32 %v399_v20, %v332_v17  ;;  %v966_v17 = vld [vmem:[#allocation11 + $0x48] sm:$0xf0]  ;;  %v964_v20 = vld [vmem:[#allocation11 + $0x40] sm:$0xf] }
 0x13a   :  { %v337_v37 = vpop.f32.mrf.mxu1 }
 0x13b   :  { %v499_v25 = vadd.f32 %v489_v21, %v400_v22  ;;  %v1039_v21 = vld [vmem:[#allocation11 + $0x44] sm:$0xf0] }
 0x13d   :  { %v507_v30 = vadd.f32 %v1070_v26, %v499_v25  ;;  %v965_v25 = vor.u32 %v1039_v21, %v964_v20 }
 0x13f   :  { %v511_v34 = vmax.f32 %v507_v30, 0.0  ;;  %v1037_v30 = vld [vmem:[#allocation11 + $0x34] sm:$0xf0]  ;;  %731 = vmatpush.bf16.msrb.mxu1 %v965_v25 }
 0x140   :  { %v401_v28 = vpop.f32.mrf.mxu2 }
 0x141   :  { %v491_v29 = vpop.f32.mrf.mxu3  ;;  %v402_v31 = vadd.f32 %v401_v28, %v334_v24  ;;  %v515_v41 = vmul.f32 %v1062_v47, %v511_v34  ;;  %v1042_v47 = vld [vmem:[#allocation11 + $0x64] sm:$0xf]  ;;  %v969_v24 = vor.u32 %v1038_v16, %v966_v17 }
 0x142   :  { %v339_v50 = vpop.f32.mrf.mxu1 }
 0x143   :  { %v500_v32 = vadd.f32 %v491_v29, %v402_v31  ;;  %v956_v29 = vld [vmem:[#allocation11 + $0x30] sm:$0xf] }
 0x144   :  { %v957_v56 = vor.u32 %v1037_v30, %v956_v29 }
 0x145   :  { %v508_v35 = vadd.f32 %v1070_v26, %v500_v32 }
 0x146   :  { %732 = vmatpush.bf16.msrb.mxu1 %v957_v56 }
 0x147   :  { %v512_v38 = vmax.f32 %v508_v35, 0.0  ;;  %v948_v35 = vld [vmem:[#allocation11 + $0x20] sm:$0xf] }
 0x148   :  { %v404_v39 = vpop.f32.mrf.mxu2 }
 0x149   :  { %v494_v40 = vpop.f32.mrf.mxu3  ;;  %v516_v42 = vmul.f32 %v1063_v51, %v512_v38  ;;  %v405_v43 = vadd.f32 %v404_v39, %v337_v37  ;;  %v982_v51 = vld [vmem:[#allocation11 + $0x68] sm:$0xf0] }
 0x14a   :  { %v985_v3 = vor.u32 %v1042_v47, %v982_v51  ;;  %v932_v47 = vld [vmem:[#allocation11] sm:$0xf] }
 0x14b   :  { %v519_v46 = vmax.f32 %v515_v41, %v516_v42  ;;  %v501_v48 = vadd.f32 %v494_v40, %v405_v43  ;;  %v949_v40 = vor.u32 %v1035_v36, %v948_v35  ;;  %v1032_v41 = vld [vmem:[#allocation11 + $0x14] sm:$0xf]  ;;  %v942_v42 = vld [vmem:[#allocation11 + $0x18] sm:$0xf0]  ;;  %v933_v51 = vor.u32 %v1031_v44, %v932_v47 }
 0x14c   :  { %742 = vmatpush.bf16.msrb.mxu2 %v985_v3 }
 0x14d   :  { %v520_v49 = vrot.slane %v519_v46, 4  ;;  %v509_v57 = vadd.f32 %v1070_v26, %v501_v48  ;;  %v945_v48 = vor.u32 %v1032_v41, %v942_v42  ;;  %733 = vmatpush.bf16.msrb.mxu1 %v949_v40 }
 0x14f   :  { %v521_v1 = vmax.f32 %v519_v46, %v520_v49  ;;  %v513_v8 = vmax.f32 %v509_v57, 0.0  ;;  %v1033_v57 = vld [vmem:[#allocation11 + $0x14] sm:$0xf0] }
 0x150   :  { %v406_v52 = vpop.f32.mrf.mxu2  ;;  %743 = vmatpush.bf16.msrb.mxu2 %v977_v14 }
 0x151   :  { %v407_v58 = vadd.f32 %v406_v52, %v339_v50  ;;  %v496_v62 = vpop.f32.mrf.mxu3  ;;  %v522_v12 = vrot.slane %v521_v1, 2  ;;  %v517_v18 = vmul.f32 %v1067_v59, %v513_v8  ;;  %v645_v8 = vperm.slane %v642_v7, 1 }
 0x153   :  { %v502_v2 = vadd.f32 %v496_v62, %v407_v58  ;;  %v523_v22 = vmax.f32 %v521_v1, %v522_v12  ;;  %v941_v58 = vor.u32 %v1033_v57, %v940_v55  ;;  %v937_v62 = vor.u32 %v1030_v60, %v934_v61 }
 0x154   :  { %744 = vmatpush.bf16.msrb.mxu2 %v969_v24 }
 0x155   :  { %v510_v9 = vadd.f32 %v1070_v26, %v502_v2  ;;  %v1036_v26 = vld [vmem:[#allocation11 + $0x34] sm:$0xf]  ;;  %v524_v32 = vrot.slane %v523_v22, 1  ;;  %734 = vmatpush.bf16.msrb.mxu1 %v941_v58 }
 0x156   :  { %v961_v59 = vor.u32 %v1036_v26, %v958_v27 }
 0x157   :  { %v514_v13 = vmax.f32 %v510_v9, 0.0  ;;  %v525_v38 = vmax.f32 %v523_v22, %v524_v32  ;;  %v644_v9 = vperm.slane %v642_v7, 0 }
 0x158   :  { %745 = vmatpush.bf16.msrb.mxu2 %v961_v59 }
 0x159   :  { %v518_v19 = vmul.f32 %v1068_v6, %v514_v13  ;;  %v1034_v6 = vld [vmem:[#allocation11 + $0x24] sm:$0xf]  ;;  %v533_v46 = vpack.c.bf16 %v525_v38, %v525_v38  ;;  %735 = vmatpush.bf16.msrb.mxu1 %v933_v51 }
 0x15a   :  { %v953_v39 = vor.u32 %v1034_v6, %v950_v33 }
 0x15b   :  { %v526_v23 = vmax.f32 %v517_v18, %v518_v19  ;;  %v557_v50 = vunpack.c.l.b16 %v533_v46 }
 0x15c   :  { %746 = vmatpush.bf16.msrb.mxu2 %v953_v39 }
 0x15d   :  { %v527_v28 = vrot.slane %v526_v23, 4 }
 0x15f   :  { %v528_v31 = vmax.f32 %v526_v23, %v527_v28 }
 0x160   :  { %747 = vmatpush.bf16.msrb.mxu2 %v945_v48 }
 0x161   :  { %v529_v34 = vrot.slane %v528_v31, 2 }
 0x163   :  { %v530_v37 = vmax.f32 %v528_v31, %v529_v34 }
 0x164   :  { %748 = vmatpush.bf16.msrb.mxu2 %v937_v62 }
 0x165   :  { %v531_v43 = vrot.slane %v530_v37, 1 }
 0x167   :  { %v532_v45 = vmax.f32 %v530_v37, %v531_v43 }
 0x169   :  { %v534_v49 = vpack.c.bf16 %v532_v45, %v532_v45 }
 0x16b   :  { %v558_v52 = vunpack.c.l.b16 %v534_v49 }
 0x16d   :  { %v560_v53 = vsel %vm559_vm5, %v558_v52, %v557_v50 }
 0x16e   :  { %v561_v54 = vpack.c.b16 %v560_v53, %v560_v53 }
 0x170   :  { %619 = vmatmul.bf16.vlgmr.msrb.gmra.mxu0 %v561_v54 }
 0x1ed   :  { %v620_v0 = vpop.f32.mrf.mxu0 }
 0x1ee   :  { %v621_v1 = vadd.f32 %v1071_v63, %v620_v0 }
 0x1f0   :  { %v624_v2 = vmax.f32 %v621_v1, 0.0 }
 0x1f2   :  { %v625_v3 = vpack.c.bf16 %v624_v2, %v624_v2 }
 0x1f4   :  { %736 = vmatmul.bf16.vlgmr.msrb.gmra.mxu1 %v625_v3  ;;  %749 = vmatmul.bf16.vlgmr.msrb.gmra.mxu2 %v625_v3 }
 0x1f5   :  { %v622_v4 = vpop.f32.mrf.mxu0 }
 0x271   :  { %v737_v5 = vpop.f32.mrf.mxu1 }
 0x272   :  { %v738_v13 = vadd.f32 %v737_v5, %v644_v9 }
 0x277   :  { %v750_v10 = vpop.f32.mrf.mxu2 }
 0x278   :  { %v751_v11 = vadd.f32 %v750_v10, %v645_v8 }
 0x279   :  { %v739_v12 = vpop.f32.mrf.mxu1 }
 0x27a   :  { %v756_v14 = vrot.slane %v751_v11, 6 }
 0x27c   :  { %v758_v15 = vsel %vm757_vm6, %v738_v13, %v756_v14 }
 0x27d   :  { %760 = vst [vmem:[#allocation12] sm:$0xf] %v758_v15 }
 0x27e   :  { %771 = dma.vmem_to_hbm [thread:$0]  %s767_s25, 64, %s769_s27, [#allocation5]  }
 0x27f   :  { %v752_v16 = vpop.f32.mrf.mxu2 }
 0x280   :  { %1222 = dma.done.wait [#allocation5], 64  }
 0x281   :  { %1223 = vsyncadd [#allocation5], 4294967232 }
 0x282   :  { %776 = vsyncpa [#allocation4], 1 }
 0x283   :  { %777 = vsyncpa [#allocation7], 1 }
 0x284   :  { %778 = vsyncpa [#allocation10], 1 }
 0x285   :  { %779 = vsyncpa [#allocation5], 1 }

</bundles_post_ra>
